<compile_context>
chip_gen: v5e
topology: v5e:2x2
jax: 0.10.0
libtpu: 0.0.40
codegen_flags: <defaults>
</compile_context>

<pallas_src>
import jax
import jax.numpy as jnp
from jax.experimental import pallas as pl
from jax.experimental.pallas import tpu as pltpu

EPS = 1e-5
NEG_SLOPE = 0.1
LANE = 128
VMEM_LIMIT_BYTES = 48 * 1024 * 1024


def _round_up(n, m):
    return ((n + m - 1) // m) * m


def _leaky_relu(x):
    return jnp.where(x >= 0, x, NEG_SLOPE * x)


def _bn_train(h, gamma, beta):
    # BatchNorm1d training mode: batch mean + biased batch variance, single
    # pass (E[x^2] - E[x]^2) to save a sublane reduction.
    mean = jnp.mean(h, axis=0, keepdims=True)
    mean_sq = jnp.mean(h * h, axis=0, keepdims=True)
    var = jnp.maximum(mean_sq - mean * mean, 0.0)
    return gamma * (h - mean) * jax.lax.rsqrt(var + EPS) + beta


# --------------------- kernel A: Linear1 (K-tiled) + BN/LReLU + hidden MLP ---
def _encoder_kernel(x_ref, w1_ref, b1_ref, g1_ref, be1_ref,
                    w2_ref, b2_ref, g2_ref, be2_ref,
                    w3_ref, b3_ref, g3_ref, be3_ref,
                    h_ref, acc_ref):
    k = pl.program_id(0)

    @pl.when(k == 0)
    def _():
        acc_ref[...] = jnp.zeros_like(acc_ref)

    # bf16 x bf16 -> f32 accumulation on the MXU.
    acc_ref[...] += jnp.dot(x_ref[...], w1_ref[...],
                            preferred_element_type=jnp.float32)

    @pl.when(k == pl.num_programs(0) - 1)
    def _():
        h = acc_ref[...] + b1_ref[...]
        h = _leaky_relu(_bn_train(h, g1_ref[...], be1_ref[...]))
        h = jnp.dot(h.astype(jnp.bfloat16), w2_ref[...],
                    preferred_element_type=jnp.float32) + b2_ref[...]
        h = _leaky_relu(_bn_train(h, g2_ref[...], be2_ref[...]))
        h = jnp.dot(h.astype(jnp.bfloat16), w3_ref[...],
                    preferred_element_type=jnp.float32) + b3_ref[...]
        h = _leaky_relu(_bn_train(h, g3_ref[...], be3_ref[...]))
        h_ref[...] = h


# --------------------- kernel B: Linear4 (N-tiled) + Tanh --------------------
def _decoder_kernel(h_ref, w4_ref, b4_ref, o_ref):
    h = h_ref[...].astype(jnp.bfloat16)
    y = jnp.dot(h, w4_ref[...], preferred_element_type=jnp.float32) + b4_ref[...]
    o_ref[...] = jnp.tanh(y)


def adversarial_model(image, params, *, tile_k=8192, tile_n=8192):
    """image: (B, C, H, W) float32, NCHW. Returns (B, C, H, W) f32 in (-1, 1)."""
    B, C, H, W = image.shape
    D = C * H * W
    hidden = params["w1"].shape[1]
    HP = _round_up(hidden, LANE)                 # 336 -> 384 (lane-dense)

    # Tile sizes: multiples of 128, clamped to the problem size.
    tile_k = _round_up(min(tile_k, D), LANE)
    tile_n = _round_up(min(tile_n, D), LANE)
    d_in_pad = _round_up(D, tile_k)
    d_out_pad = _round_up(D, tile_n)
    num_k = d_in_pad // tile_k
    num_n = d_out_pad // tile_n

    # nn.Flatten (row-major) + zero-pad the contraction dim; bf16 activations
    # feed the MXU directly.
    x = image.reshape(B, D)
    x = jnp.pad(x, ((0, 0), (0, d_in_pad - D))).astype(jnp.bfloat16)

    def pad2(a, rows, cols):
        return jnp.pad(a, ((0, rows - a.shape[0]), (0, cols - a.shape[1])))

    # Big weights streamed as bf16 (halves HBM traffic); zero padding keeps the
    # padded hidden lanes exactly zero end-to-end.
    w1 = pad2(params["w1"], d_in_pad, HP).astype(jnp.bfloat16)
    w2 = pad2(params["w2"], HP, HP).astype(jnp.bfloat16)
    w3 = pad2(params["w3"], HP, HP).astype(jnp.bfloat16)
    w4 = pad2(params["w4"], HP, d_out_pad).astype(jnp.bfloat16)

    b1 = pad2(params["b1"], 1, HP)
    g1 = pad2(params["g1"], 1, HP)
    be1 = pad2(params["be1"], 1, HP)
    b2 = pad2(params["b2"], 1, HP)
    g2 = pad2(params["g2"], 1, HP)
    be2 = pad2(params["be2"], 1, HP)
    b3 = pad2(params["b3"], 1, HP)
    g3 = pad2(params["g3"], 1, HP)
    be3 = pad2(params["be3"], 1, HP)
    b4 = pad2(params["b4"], 1, d_out_pad)

    resident = lambda k: (0, 0)   # same block every grid step -> stays in VMEM

    h_mid = pl.pallas_call(
        _encoder_kernel,
        out_shape=jax.ShapeDtypeStruct((B, HP), jnp.float32),
        grid_spec=pltpu.PrefetchScalarGridSpec(
            num_scalar_prefetch=0,
            grid=(num_k,),
            in_specs=[
                pl.BlockSpec((B, tile_k), lambda k: (0, k)),    # x   (K-tiled)
                pl.BlockSpec((tile_k, HP), lambda k: (k, 0)),   # w1  (K-tiled)
                pl.BlockSpec((1, HP), resident),                # b1
                pl.BlockSpec((1, HP), resident),                # g1
                pl.BlockSpec((1, HP), resident),                # be1
                pl.BlockSpec((HP, HP), resident),               # w2  (resident)
                pl.BlockSpec((1, HP), resident),                # b2
                pl.BlockSpec((1, HP), resident),                # g2
                pl.BlockSpec((1, HP), resident),                # be2
                pl.BlockSpec((HP, HP), resident),               # w3  (resident)
                pl.BlockSpec((1, HP), resident),                # b3
                pl.BlockSpec((1, HP), resident),                # g3
                pl.BlockSpec((1, HP), resident),                # be3
            ],
            out_specs=pl.BlockSpec((B, HP), resident),
            scratch_shapes=[pltpu.VMEM((B, HP), jnp.float32)],
        ),
        compiler_params=pltpu.CompilerParams(
            dimension_semantics=("arbitrary",),   # K reduction carries the accumulator
            vmem_limit_bytes=VMEM_LIMIT_BYTES),
    )(x, w1, b1, g1, be1, w2, b2, g2, be2, w3, b3, g3, be3)

    out = pl.pallas_call(
        _decoder_kernel,
        out_shape=jax.ShapeDtypeStruct((B, d_out_pad), jnp.float32),
        grid_spec=pltpu.PrefetchScalarGridSpec(
            num_scalar_prefetch=0,
            grid=(num_n,),
            in_specs=[
                pl.BlockSpec((B, HP), lambda n: (0, 0)),        # h  (resident)
                pl.BlockSpec((HP, tile_n), lambda n: (0, n)),   # w4 (N-tiled)
                pl.BlockSpec((1, tile_n), lambda n: (0, n)),    # b4 (N-tiled)
            ],
            out_specs=pl.BlockSpec((B, tile_n), lambda n: (0, n)),
        ),
        compiler_params=pltpu.CompilerParams(
            dimension_semantics=("parallel",),    # independent output tiles (v7x: 2 TCs)
            vmem_limit_bytes=VMEM_LIMIT_BYTES),
    )(h_mid, w4, b4)

    return out[:, :D].reshape(B, C, H, W)        # Unflatten(-1, C, H, W)


def init_params(key, d_in, hidden, d_out):
    """PyTorch-style init: Linear U(-1/sqrt(fan_in), 1/sqrt(fan_in)),
    BatchNorm gamma=1, beta=0. Weights stored as (in, out), f32."""
    ks = jax.random.split(key, 8)

    def linear(kw, kb, fan_in, fan_out):
        bound = 1.0 / jnp.sqrt(fan_in)
        w = jax.random.uniform(kw, (fan_in, fan_out), jnp.float32, -bound, bound)
        b = jax.random.uniform(kb, (1, fan_out), jnp.float32, -bound, bound)
        return w, b

    w1, b1 = linear(ks[0], ks[1], d_in, hidden)
    w2, b2 = linear(ks[2], ks[3], hidden, hidden)
    w3, b3 = linear(ks[4], ks[5], hidden, hidden)
    w4, b4 = linear(ks[6], ks[7], hidden, d_out)

    ones = jnp.ones((1, hidden), jnp.float32)
    zeros = jnp.zeros((1, hidden), jnp.float32)

    return {
        "w1": w1, "b1": b1, "g1": ones, "be1": zeros,
        "w2": w2, "b2": b2, "g2": ones, "be2": zeros,
        "w3": w3, "b3": b3, "g3": ones, "be3": zeros,
        "w4": w4, "b4": b4,
    }


if __name__ == "__main__":
    # Small shapes consistent with the module's forward (NCHW in, same-shape
    # tanh-bounded image out). Reference uses C=3, H=W=224, hidden=336; spatial
    # is scaled down here, hidden kept at 336. Small tiles (256) are used so the
    # K-tiled accumulator and N-tiled output paths are exercised (grid of 3 each).
    B, C, H, W = 2, 3, 16, 16
    HIDDEN = 336
    D = C * H * W

    key = jax.random.PRNGKey(0)
    k_img, k_par = jax.random.split(key)

    image = jax.random.normal(k_img, (B, C, H, W), dtype=jnp.float32)
    params = init_params(k_par, D, HIDDEN, D)

    out = adversarial_model(image, params, tile_k=256, tile_n=256)
    out = jax.block_until_ready(out)

    assert out.shape == (B, C, H, W)
    assert out.dtype == jnp.float32
    assert bool(jnp.all(jnp.isfinite(out)))
    assert bool(jnp.all(jnp.abs(out) <= 1.0))   # tanh output range

    print("KERNEL_OK")
</pallas_src>

<mosaic_0001>
module attributes {stable_mosaic.version = 11 : i64} {
  func.func @_encoder_kernel(%arg0: i32, %arg1: memref<2x256xbf16, #tpu.memory_space<vmem>>, %arg2: memref<256x384xbf16, #tpu.memory_space<vmem>>, %arg3: memref<1x384xf32, #tpu.memory_space<vmem>>, %arg4: memref<1x384xf32, #tpu.memory_space<vmem>>, %arg5: memref<1x384xf32, #tpu.memory_space<vmem>>, %arg6: memref<384x384xbf16, #tpu.memory_space<vmem>>, %arg7: memref<1x384xf32, #tpu.memory_space<vmem>>, %arg8: memref<1x384xf32, #tpu.memory_space<vmem>>, %arg9: memref<1x384xf32, #tpu.memory_space<vmem>>, %arg10: memref<384x384xbf16, #tpu.memory_space<vmem>>, %arg11: memref<1x384xf32, #tpu.memory_space<vmem>>, %arg12: memref<1x384xf32, #tpu.memory_space<vmem>>, %arg13: memref<1x384xf32, #tpu.memory_space<vmem>>, %arg14: memref<2x384xf32, #tpu.memory_space<vmem>>, %arg15: memref<2x384xf32, #tpu.memory_space<vmem>>) attributes {dimension_semantics = [#tpu.dimension_semantics<arbitrary>], iteration_bounds = array<i64: 3>, scalar_prefetch = 0 : i64, scratch_operands = 1 : i64, tpu.core_type = #tpu.core_type<tc>, window_params = [{transform_indices = @transform_0, window_bounds = array<i64: 2, 256>}, {transform_indices = @transform_1, window_bounds = array<i64: 256, 384>}, {pipeline_mode = #tpu.pipeline_mode<synchronous>, transform_indices = @transform_2, window_bounds = array<i64: 1, 384>}, {pipeline_mode = #tpu.pipeline_mode<synchronous>, transform_indices = @transform_3, window_bounds = array<i64: 1, 384>}, {pipeline_mode = #tpu.pipeline_mode<synchronous>, transform_indices = @transform_4, window_bounds = array<i64: 1, 384>}, {pipeline_mode = #tpu.pipeline_mode<synchronous>, transform_indices = @transform_5, window_bounds = array<i64: 384, 384>}, {pipeline_mode = #tpu.pipeline_mode<synchronous>, transform_indices = @transform_6, window_bounds = array<i64: 1, 384>}, {pipeline_mode = #tpu.pipeline_mode<synchronous>, transform_indices = @transform_7, window_bounds = array<i64: 1, 384>}, {pipeline_mode = #tpu.pipeline_mode<synchronous>, transform_indices = @transform_8, window_bounds = array<i64: 1, 384>}, {pipeline_mode = #tpu.pipeline_mode<synchronous>, transform_indices = @transform_9, window_bounds = array<i64: 384, 384>}, {pipeline_mode = #tpu.pipeline_mode<synchronous>, transform_indices = @transform_10, window_bounds = array<i64: 1, 384>}, {pipeline_mode = #tpu.pipeline_mode<synchronous>, transform_indices = @transform_11, window_bounds = array<i64: 1, 384>}, {pipeline_mode = #tpu.pipeline_mode<synchronous>, transform_indices = @transform_12, window_bounds = array<i64: 1, 384>}, {pipeline_mode = #tpu.pipeline_mode<synchronous>, transform_indices = @transform_13, window_bounds = array<i64: 2, 384>}]} {
    %c0_i32 = arith.constant 0 : i32
    %0 = arith.cmpi eq, %arg0, %c0_i32 : i32
    %1 = arith.extui %0 : i1 to i32
    %c0_i32_0 = arith.constant 0 : i32
    %2 = arith.cmpi ne, %1, %c0_i32_0 : i32
    scf.if %2 {
      %cst_9 = arith.constant 0.000000e+00 : f32
      %12 = vector.broadcast %cst_9 : f32 to vector<2x384xf32>
      %c0_10 = arith.constant 0 : index
      %c0_11 = arith.constant 0 : index
      %13 = vector.load %arg15[%c0_10, %c0_11] : memref<2x384xf32, #tpu.memory_space<vmem>>, vector<2x384xf32>
      tpu.vector_store %arg15[%c0_10, %c0_11], %12 {strides = array<i32>} : memref<2x384xf32, #tpu.memory_space<vmem>>, vector<2x384xf32>,
    } else {
    }
    %c0 = arith.constant 0 : index
    %c0_1 = arith.constant 0 : index
    %3 = vector.load %arg15[%c0, %c0_1] : memref<2x384xf32, #tpu.memory_space<vmem>>, vector<2x384xf32>
    %c0_2 = arith.constant 0 : index
    %c0_3 = arith.constant 0 : index
    %4 = vector.load %arg1[%c0_2, %c0_3] : memref<2x256xbf16, #tpu.memory_space<vmem>>, vector<2x256xbf16>
    %c0_4 = arith.constant 0 : index
    %c0_5 = arith.constant 0 : index
    %5 = vector.load %arg2[%c0_4, %c0_5] : memref<256x384xbf16, #tpu.memory_space<vmem>>, vector<256x384xbf16>
    %cst = arith.constant dense<0.000000e+00> : vector<2x384xf32>
    %6 = tpu.matmul %4, %5, %cst {dimension_numbers = #tpu.dot_dimension_numbers<[1], [0], [0], [1], [0, 0, 1, 1], [], []>} : vector<2x256xbf16>, vector<256x384xbf16>, vector<2x384xf32> -> vector<2x384xf32>
    %7 = arith.addf %3, %6 : vector<2x384xf32>
    %c0_6 = arith.constant 0 : index
    %c0_7 = arith.constant 0 : index
    %8 = vector.load %arg15[%c0_6, %c0_7] : memref<2x384xf32, #tpu.memory_space<vmem>>, vector<2x384xf32>
    tpu.vector_store %arg15[%c0_6, %c0_7], %7 {strides = array<i32>} : memref<2x384xf32, #tpu.memory_space<vmem>>, vector<2x384xf32>,
    %c2_i32 = arith.constant 2 : i32
    %9 = arith.cmpi eq, %arg0, %c2_i32 : i32
    %10 = arith.extui %9 : i1 to i32
    %c0_i32_8 = arith.constant 0 : i32
    %11 = arith.cmpi ne, %10, %c0_i32_8 : i32
    scf.if %11 {
      %c0_9 = arith.constant 0 : index
      %c0_10 = arith.constant 0 : index
      %12 = vector.load %arg15[%c0_9, %c0_10] : memref<2x384xf32, #tpu.memory_space<vmem>>, vector<2x384xf32>
      %c0_11 = arith.constant 0 : index
      %c0_12 = arith.constant 0 : index
      %13 = vector.load %arg3[%c0_11, %c0_12] : memref<1x384xf32, #tpu.memory_space<vmem>>, vector<1x384xf32>
      %14 = vector.broadcast %13 : vector<1x384xf32> to vector<2x384xf32>
      %15 = arith.addf %12, %14 : vector<2x384xf32>
      %c0_13 = arith.constant 0 : index
      %c0_14 = arith.constant 0 : index
      %16 = vector.load %arg4[%c0_13, %c0_14] : memref<1x384xf32, #tpu.memory_space<vmem>>, vector<1x384xf32>
      %c0_15 = arith.constant 0 : index
      %c0_16 = arith.constant 0 : index
      %17 = vector.load %arg5[%c0_15, %c0_16] : memref<1x384xf32, #tpu.memory_space<vmem>>, vector<1x384xf32>
      %cst_17 = arith.constant dense<0.000000e+00> : vector<384xf32>
      %18 = vector.multi_reduction <add>, %15, %cst_17 [0] : vector<2x384xf32> to vector<384xf32>
      %19 = vector.shape_cast %18 : vector<384xf32> to vector<1x384xf32>
      %cst_18 = arith.constant 2.000000e+00 : f32
      %20 = vector.broadcast %cst_18 : f32 to vector<1x384xf32>
      %21 = arith.divf %19, %20 : vector<1x384xf32>
      %22 = arith.mulf %15, %15 : vector<2x384xf32>
      %cst_19 = arith.constant dense<0.000000e+00> : vector<384xf32>
      %23 = vector.multi_reduction <add>, %22, %cst_19 [0] : vector<2x384xf32> to vector<384xf32>
      %24 = vector.shape_cast %23 : vector<384xf32> to vector<1x384xf32>
      %cst_20 = arith.constant 2.000000e+00 : f32
      %25 = vector.broadcast %cst_20 : f32 to vector<1x384xf32>
      %26 = arith.divf %24, %25 : vector<1x384xf32>
      %27 = arith.mulf %21, %21 : vector<1x384xf32>
      %28 = arith.subf %26, %27 : vector<1x384xf32>
      %cst_21 = arith.constant 0.000000e+00 : f32
      %29 = vector.broadcast %cst_21 : f32 to vector<1x384xf32>
      %30 = arith.maximumf %28, %29 : vector<1x384xf32>
      %31 = vector.broadcast %21 : vector<1x384xf32> to vector<2x384xf32>
      %32 = arith.subf %15, %31 : vector<2x384xf32>
      %33 = vector.broadcast %16 : vector<1x384xf32> to vector<2x384xf32>
      %34 = arith.mulf %33, %32 : vector<2x384xf32>
      %cst_22 = arith.constant 9.99999974E-6 : f32
      %35 = vector.broadcast %cst_22 : f32 to vector<1x384xf32>
      %36 = arith.addf %30, %35 : vector<1x384xf32>
      %37 = math.rsqrt %36 : vector<1x384xf32>
      %38 = vector.broadcast %37 : vector<1x384xf32> to vector<2x384xf32>
      %39 = arith.mulf %34, %38 : vector<2x384xf32>
      %40 = vector.broadcast %17 : vector<1x384xf32> to vector<2x384xf32>
      %41 = arith.addf %39, %40 : vector<2x384xf32>
      %cst_23 = arith.constant 0.000000e+00 : f32
      %42 = vector.broadcast %cst_23 : f32 to vector<2x384xf32>
      %43 = arith.cmpf oge, %41, %42 : vector<2x384xf32>
      %cst_24 = arith.constant 1.000000e-01 : f32
      %44 = vector.broadcast %cst_24 : f32 to vector<2x384xf32>
      %45 = arith.mulf %44, %41 : vector<2x384xf32>
      %46 = arith.select %43, %41, %45 : vector<2x384xi1>, vector<2x384xf32>
      %47 = arith.truncf %46 : vector<2x384xf32> to vector<2x384xbf16>
      %c0_25 = arith.constant 0 : index
      %c0_26 = arith.constant 0 : index
      %48 = vector.load %arg6[%c0_25, %c0_26] : memref<384x384xbf16, #tpu.memory_space<vmem>>, vector<384x384xbf16>
      %cst_27 = arith.constant dense<0.000000e+00> : vector<2x384xf32>
      %49 = tpu.matmul %47, %48, %cst_27 {dimension_numbers = #tpu.dot_dimension_numbers<[1], [0], [0], [1], [0, 0, 1, 1], [], []>} : vector<2x384xbf16>, vector<384x384xbf16>, vector<2x384xf32> -> vector<2x384xf32>
      %c0_28 = arith.constant 0 : index
      %c0_29 = arith.constant 0 : index
      %50 = vector.load %arg7[%c0_28, %c0_29] : memref<1x384xf32, #tpu.memory_space<vmem>>, vector<1x384xf32>
      %51 = vector.broadcast %50 : vector<1x384xf32> to vector<2x384xf32>
      %52 = arith.addf %49, %51 : vector<2x384xf32>
      %c0_30 = arith.constant 0 : index
      %c0_31 = arith.constant 0 : index
      %53 = vector.load %arg8[%c0_30, %c0_31] : memref<1x384xf32, #tpu.memory_space<vmem>>, vector<1x384xf32>
      %c0_32 = arith.constant 0 : index
      %c0_33 = arith.constant 0 : index
      %54 = vector.load %arg9[%c0_32, %c0_33] : memref<1x384xf32, #tpu.memory_space<vmem>>, vector<1x384xf32>
      %cst_34 = arith.constant dense<0.000000e+00> : vector<384xf32>
      %55 = vector.multi_reduction <add>, %52, %cst_34 [0] : vector<2x384xf32> to vector<384xf32>
      %56 = vector.shape_cast %55 : vector<384xf32> to vector<1x384xf32>
      %cst_35 = arith.constant 2.000000e+00 : f32
      %57 = vector.broadcast %cst_35 : f32 to vector<1x384xf32>
      %58 = arith.divf %56, %57 : vector<1x384xf32>
      %59 = arith.mulf %52, %52 : vector<2x384xf32>
      %cst_36 = arith.constant dense<0.000000e+00> : vector<384xf32>
      %60 = vector.multi_reduction <add>, %59, %cst_36 [0] : vector<2x384xf32> to vector<384xf32>
      %61 = vector.shape_cast %60 : vector<384xf32> to vector<1x384xf32>
      %cst_37 = arith.constant 2.000000e+00 : f32
      %62 = vector.broadcast %cst_37 : f32 to vector<1x384xf32>
      %63 = arith.divf %61, %62 : vector<1x384xf32>
      %64 = arith.mulf %58, %58 : vector<1x384xf32>
      %65 = arith.subf %63, %64 : vector<1x384xf32>
      %cst_38 = arith.constant 0.000000e+00 : f32
      %66 = vector.broadcast %cst_38 : f32 to vector<1x384xf32>
      %67 = arith.maximumf %65, %66 : vector<1x384xf32>
      %68 = vector.broadcast %58 : vector<1x384xf32> to vector<2x384xf32>
      %69 = arith.subf %52, %68 : vector<2x384xf32>
      %70 = vector.broadcast %53 : vector<1x384xf32> to vector<2x384xf32>
      %71 = arith.mulf %70, %69 : vector<2x384xf32>
      %cst_39 = arith.constant 9.99999974E-6 : f32
      %72 = vector.broadcast %cst_39 : f32 to vector<1x384xf32>
      %73 = arith.addf %67, %72 : vector<1x384xf32>
      %74 = math.rsqrt %73 : vector<1x384xf32>
      %75 = vector.broadcast %74 : vector<1x384xf32> to vector<2x384xf32>
      %76 = arith.mulf %71, %75 : vector<2x384xf32>
      %77 = vector.broadcast %54 : vector<1x384xf32> to vector<2x384xf32>
      %78 = arith.addf %76, %77 : vector<2x384xf32>
      %cst_40 = arith.constant 0.000000e+00 : f32
      %79 = vector.broadcast %cst_40 : f32 to vector<2x384xf32>
      %80 = arith.cmpf oge, %78, %79 : vector<2x384xf32>
      %cst_41 = arith.constant 1.000000e-01 : f32
      %81 = vector.broadcast %cst_41 : f32 to vector<2x384xf32>
      %82 = arith.mulf %81, %78 : vector<2x384xf32>
      %83 = arith.select %80, %78, %82 : vector<2x384xi1>, vector<2x384xf32>
      %84 = arith.truncf %83 : vector<2x384xf32> to vector<2x384xbf16>
      %c0_42 = arith.constant 0 : index
      %c0_43 = arith.constant 0 : index
      %85 = vector.load %arg10[%c0_42, %c0_43] : memref<384x384xbf16, #tpu.memory_space<vmem>>, vector<384x384xbf16>
      %cst_44 = arith.constant dense<0.000000e+00> : vector<2x384xf32>
      %86 = tpu.matmul %84, %85, %cst_44 {dimension_numbers = #tpu.dot_dimension_numbers<[1], [0], [0], [1], [0, 0, 1, 1], [], []>} : vector<2x384xbf16>, vector<384x384xbf16>, vector<2x384xf32> -> vector<2x384xf32>
      %c0_45 = arith.constant 0 : index
      %c0_46 = arith.constant 0 : index
      %87 = vector.load %arg11[%c0_45, %c0_46] : memref<1x384xf32, #tpu.memory_space<vmem>>, vector<1x384xf32>
      %88 = vector.broadcast %87 : vector<1x384xf32> to vector<2x384xf32>
      %89 = arith.addf %86, %88 : vector<2x384xf32>
      %c0_47 = arith.constant 0 : index
      %c0_48 = arith.constant 0 : index
      %90 = vector.load %arg12[%c0_47, %c0_48] : memref<1x384xf32, #tpu.memory_space<vmem>>, vector<1x384xf32>
      %c0_49 = arith.constant 0 : index
      %c0_50 = arith.constant 0 : index
      %91 = vector.load %arg13[%c0_49, %c0_50] : memref<1x384xf32, #tpu.memory_space<vmem>>, vector<1x384xf32>
      %cst_51 = arith.constant dense<0.000000e+00> : vector<384xf32>
      %92 = vector.multi_reduction <add>, %89, %cst_51 [0] : vector<2x384xf32> to vector<384xf32>
      %93 = vector.shape_cast %92 : vector<384xf32> to vector<1x384xf32>
      %cst_52 = arith.constant 2.000000e+00 : f32
      %94 = vector.broadcast %cst_52 : f32 to vector<1x384xf32>
      %95 = arith.divf %93, %94 : vector<1x384xf32>
      %96 = arith.mulf %89, %89 : vector<2x384xf32>
      %cst_53 = arith.constant dense<0.000000e+00> : vector<384xf32>
      %97 = vector.multi_reduction <add>, %96, %cst_53 [0] : vector<2x384xf32> to vector<384xf32>
      %98 = vector.shape_cast %97 : vector<384xf32> to vector<1x384xf32>
      %cst_54 = arith.constant 2.000000e+00 : f32
      %99 = vector.broadcast %cst_54 : f32 to vector<1x384xf32>
      %100 = arith.divf %98, %99 : vector<1x384xf32>
      %101 = arith.mulf %95, %95 : vector<1x384xf32>
      %102 = arith.subf %100, %101 : vector<1x384xf32>
      %cst_55 = arith.constant 0.000000e+00 : f32
      %103 = vector.broadcast %cst_55 : f32 to vector<1x384xf32>
      %104 = arith.maximumf %102, %103 : vector<1x384xf32>
      %105 = vector.broadcast %95 : vector<1x384xf32> to vector<2x384xf32>
      %106 = arith.subf %89, %105 : vector<2x384xf32>
      %107 = vector.broadcast %90 : vector<1x384xf32> to vector<2x384xf32>
      %108 = arith.mulf %107, %106 : vector<2x384xf32>
      %cst_56 = arith.constant 9.99999974E-6 : f32
      %109 = vector.broadcast %cst_56 : f32 to vector<1x384xf32>
      %110 = arith.addf %104, %109 : vector<1x384xf32>
      %111 = math.rsqrt %110 : vector<1x384xf32>
      %112 = vector.broadcast %111 : vector<1x384xf32> to vector<2x384xf32>
      %113 = arith.mulf %108, %112 : vector<2x384xf32>
      %114 = vector.broadcast %91 : vector<1x384xf32> to vector<2x384xf32>
      %115 = arith.addf %113, %114 : vector<2x384xf32>
      %cst_57 = arith.constant 0.000000e+00 : f32
      %116 = vector.broadcast %cst_57 : f32 to vector<2x384xf32>
      %117 = arith.cmpf oge, %115, %116 : vector<2x384xf32>
      %cst_58 = arith.constant 1.000000e-01 : f32
      %118 = vector.broadcast %cst_58 : f32 to vector<2x384xf32>
      %119 = arith.mulf %118, %115 : vector<2x384xf32>
      %120 = arith.select %117, %115, %119 : vector<2x384xi1>, vector<2x384xf32>
      %c0_59 = arith.constant 0 : index
      %c0_60 = arith.constant 0 : index
      %121 = vector.load %arg14[%c0_59, %c0_60] : memref<2x384xf32, #tpu.memory_space<vmem>>, vector<2x384xf32>
      tpu.vector_store %arg14[%c0_59, %c0_60], %120 {strides = array<i32>} : memref<2x384xf32, #tpu.memory_space<vmem>>, vector<2x384xf32>,
    } else {
    }
    return
  }
  func.func @transform_0(%arg0: i32) -> (i32, i32) {
    %c0_i32 = arith.constant 0 : i32
    %c0_i32_0 = arith.constant 0 : i32
    return %c0_i32, %arg0 : i32, i32
  }
  func.func @transform_1(%arg0: i32) -> (i32, i32) {
    %c0_i32 = arith.constant 0 : i32
    %c0_i32_0 = arith.constant 0 : i32
    return %arg0, %c0_i32 : i32, i32
  }
  func.func @transform_2(%arg0: i32) -> (i32, i32) {
    %c0_i32 = arith.constant 0 : i32
    %c0_i32_0 = arith.constant 0 : i32
    %c0_i32_1 = arith.constant 0 : i32
    return %c0_i32, %c0_i32_0 : i32, i32
  }
  func.func @transform_3(%arg0: i32) -> (i32, i32) {
    %c0_i32 = arith.constant 0 : i32
    %c0_i32_0 = arith.constant 0 : i32
    %c0_i32_1 = arith.constant 0 : i32
    return %c0_i32, %c0_i32_0 : i32, i32
  }
  func.func @transform_4(%arg0: i32) -> (i32, i32) {
    %c0_i32 = arith.constant 0 : i32
    %c0_i32_0 = arith.constant 0 : i32
    %c0_i32_1 = arith.constant 0 : i32
    return %c0_i32, %c0_i32_0 : i32, i32
  }
  func.func @transform_5(%arg0: i32) -> (i32, i32) {
    %c0_i32 = arith.constant 0 : i32
    %c0_i32_0 = arith.constant 0 : i32
    %c0_i32_1 = arith.constant 0 : i32
    return %c0_i32, %c0_i32_0 : i32, i32
  }
  func.func @transform_6(%arg0: i32) -> (i32, i32) {
    %c0_i32 = arith.constant 0 : i32
    %c0_i32_0 = arith.constant 0 : i32
    %c0_i32_1 = arith.constant 0 : i32
    return %c0_i32, %c0_i32_0 : i32, i32
  }
  func.func @transform_7(%arg0: i32) -> (i32, i32) {
    %c0_i32 = arith.constant 0 : i32
    %c0_i32_0 = arith.constant 0 : i32
    %c0_i32_1 = arith.constant 0 : i32
    return %c0_i32, %c0_i32_0 : i32, i32
  }
  func.func @transform_8(%arg0: i32) -> (i32, i32) {
    %c0_i32 = arith.constant 0 : i32
    %c0_i32_0 = arith.constant 0 : i32
    %c0_i32_1 = arith.constant 0 : i32
    return %c0_i32, %c0_i32_0 : i32, i32
  }
  func.func @transform_9(%arg0: i32) -> (i32, i32) {
    %c0_i32 = arith.constant 0 : i32
    %c0_i32_0 = arith.constant 0 : i32
    %c0_i32_1 = arith.constant 0 : i32
    return %c0_i32, %c0_i32_0 : i32, i32
  }
  func.func @transform_10(%arg0: i32) -> (i32, i32) {
    %c0_i32 = arith.constant 0 : i32
    %c0_i32_0 = arith.constant 0 : i32
    %c0_i32_1 = arith.constant 0 : i32
    return %c0_i32, %c0_i32_0 : i32, i32
  }
  func.func @transform_11(%arg0: i32) -> (i32, i32) {
    %c0_i32 = arith.constant 0 : i32
    %c0_i32_0 = arith.constant 0 : i32
    %c0_i32_1 = arith.constant 0 : i32
    return %c0_i32, %c0_i32_0 : i32, i32
  }
  func.func @transform_12(%arg0: i32) -> (i32, i32) {
    %c0_i32 = arith.constant 0 : i32
    %c0_i32_0 = arith.constant 0 : i32
    %c0_i32_1 = arith.constant 0 : i32
    return %c0_i32, %c0_i32_0 : i32, i32
  }
  func.func @transform_13(%arg0: i32) -> (i32, i32) {
    %c0_i32 = arith.constant 0 : i32
    %c0_i32_0 = arith.constant 0 : i32
    %c0_i32_1 = arith.constant 0 : i32
    return %c0_i32, %c0_i32_0 : i32, i32
  }
}

</mosaic_0001>

<bundles_post_ra>
// kernel: tpu_custom_call.1
= control target key start
LH: loop header
LB: loop body
LE: loop exit
PB: predicated region body
PF: predicated region fallthrough
CT: control target
= control target key end

     0   :  { %s4976_s0 = inlined_call_operand.hbm [shape: bf16[2,768], index: 0, kind: input, shape index: {}]   ;;  %s4977_s1 = inlined_call_operand.hbm [shape: bf16[768,384], index: 1, kind: input, shape index: {}]   ;;  %s4978_s2 = inlined_call_operand.hbm [shape: f32[1,384], index: 2, kind: input, shape index: {}]   ;;  %s4979_s3 = inlined_call_operand.hbm [shape: f32[1,384], index: 3, kind: input, shape index: {}]   ;;  %s4980_s4 = inlined_call_operand.vmem [shape: f32[1,384], index: 4, kind: input, shape index: {}]   ;;  %s4981_s5 = inlined_call_operand.hbm [shape: bf16[384,384], index: 5, kind: input, shape index: {}]   ;;  %s4982_s6 = inlined_call_operand.hbm [shape: f32[1,384], index: 6, kind: input, shape index: {}]   ;;  %s4983_s7 = inlined_call_operand.vmem [shape: f32[1,384], index: 7, kind: input, shape index: {}]   ;;  %s4984_s8 = inlined_call_operand.hbm [shape: f32[1,384], index: 8, kind: input, shape index: {}]   ;;  %s4985_s9 = inlined_call_operand.hbm [shape: bf16[384,384], index: 9, kind: input, shape index: {}]   ;;  %s4986_s10 = inlined_call_operand.vmem [shape: f32[1,384], index: 10, kind: input, shape index: {}]   ;;  %s4987_s11 = inlined_call_operand.hbm [shape: f32[1,384], index: 11, kind: input, shape index: {}]   ;;  %s4988_s12 = inlined_call_operand.hbm [shape: f32[1,384], index: 12, kind: input, shape index: {}]   ;;  %s4989_s13 = inlined_call_operand.hbm [shape: f32[2,384], index: 13, kind: output, shape index: {}]  }
   0x1   :  { %4992 = sst [smem:[#allocation29_spill]] %s4978_s2 }
   0x2   :  { %4993 = sst [smem:[#allocation30_spill]] %s4979_s3 }
   0x3   :  { %4994 = sst [smem:[#allocation31_spill]] %s4981_s5 }
   0x4   :  { %4995 = sst [smem:[#allocation32_spill]] %s4982_s6 }
   0x5   :  { %4996 = sst [smem:[#allocation33_spill]] %s4984_s8 }
   0x6   :  { %4997 = sst [smem:[#allocation34_spill]] %s4985_s9 }
   0x7   :  { %4998 = sst [smem:[#allocation35_spill]] %s4986_s10 }
   0x8   :  { %4999 = sst [smem:[#allocation36_spill]] %s4987_s11 }
   0x9   :  { %5000 = sst [smem:[#allocation37_spill]] %s4989_s13 }
   0xa   :  { %18 = vsyncpa [#allocation4], 0 }
   0xb   :  { %20 = vsyncpa [#allocation4 + $0x1], 0 }
   0xc   :  { %21 = vsyncpa [#allocation7], 0 }
   0xd   :  { %23 = vsyncpa [#allocation7 + $0x1], 0 }
   0xe   :  { %24 = vsyncpa [#allocation10], 0 }
   0xf   :  { %25 = vsyncpa [#allocation13], 0 }
  0x10   :  { %26 = vsyncpa [#allocation16], 0 }
  0x11   :  { %27 = vsyncpa [#allocation19], 0 }
  0x12   :  { %28 = vsyncpa [#allocation5], 0  ;;  %s4484_s25 = smov 0   ;;  %s4486_s26 = smov 0  }
  0x13   :  { %s4488_s27 = smov 0   ;;  %s4490_s28 = smov 0  }
  0x14 LB: > { %s5001_s2 = sld [smem:[#allocation29_spill]]  ;;  %s4508_s15 = sadd.s32 4294967295, %s4399_s28   ;;  %s4399_s28 = sphi %s4490_s28, %s5021_s28   ;;  %s4395_s27 = sphi %s4488_s27, %s5020_s27   ;;  %s4391_s26 = sphi %s4486_s26, %s5019_s26   ;;  %s4387_s25 = sphi %s4484_s25, %s5018_s25  }
  0x15   : > { %p2859_p0 = scmp.ge.s32.totalorder %s4399_s28, 1  ;;  %p55_p1 = scmp.eq.s32.totalorder %s4508_s15, 0 }
  0x16   : > { %p343_p2 = scmp.lt.s32.totalorder %s4399_s28, 4  ;;  %p2860_p3 = scmp.ne.s32.totalorder %s4508_s15, 0 }
  0x17   : > { %s4401_s17 = smov [#allocation8]   ;;  %s5003_s3 = sld [smem:[#allocation30_spill]] }
  0x18   : > { %p4514_p4 = pnand %p2859_p0, %p343_p2  ;;  %s357_s18 = sshll.u32 %s4401_s17, 4  ;;  %s358_s18 = int_to_ptr.vmem [resolvable:$true] %s357_s18 }
  0x19   : > { %s4402_s23 = smov [#allocation9]   ;;  %s5005_s6 = sld [smem:[#allocation32_spill]] }
  0x1a   : > { %s355_s14 = sshll.u32 %s5001_s2, 4  ;;  %p3893_p5 = pneg %p4514_p4  ;;  %s356_s14 = int_to_ptr.hbm [resolvable:$true] %s355_s14 }
  0x1b   : > { %s369_s24 = sshll.u32 %s4402_s23, 4  ;;  %s4403_s19 = smov [#allocation12]   ;;  %s370_s24 = int_to_ptr.vmem [resolvable:$true] %s369_s24 }
  0x1c   : > { %p4525_p6 = pnand %p3893_p5, %p55_p1  ;;  %s398_s20 = sshll.u32 %s4403_s19, 4  ;;  %s399_s20 = int_to_ptr.vmem [resolvable:$true] %s398_s20 }
  0x1d   : > { %s367_s21 = sshll.u32 %s5003_s3, 4  ;;  %s5006_s9 = sld [smem:[#allocation34_spill]]  ;;  %s368_s21 = int_to_ptr.hbm [resolvable:$true] %s367_s21 }
  0x1e   : > { %3896 = dma.hbm_to_vmem [thread:$0]  (!%p4525_p6), %s356_s14, 48, %s358_s18, [#allocation7]  }
  0x1f   : > { %s396_s17 = sshll.u32 %s5005_s6, 4  ;;  %s4404_s23 = smov [#allocation15]   ;;  %s397_s17 = int_to_ptr.hbm [resolvable:$true] %s396_s17 }
  0x20   : > { %3899 = dma.hbm_to_vmem [thread:$0]  (!%p4525_p6), %s368_s21, 48, %s370_s24, [#allocation10]  }
  0x21   : > { %3905 = dma.hbm_to_vmem [thread:$0]  (!%p4525_p6), %s397_s17, 48, %s399_s20, [#allocation13]  }
  0x22   : > { %s424_s29 = sshll.u32 %s4404_s23, 4  ;;  %s5007_s5 = sld [smem:[#allocation31_spill]]  ;;  %s425_s29 = int_to_ptr.vmem [resolvable:$true] %s424_s29 }
  0x23   : > { %s422_s13 = sshll.u32 %s5006_s9, 4  ;;  %s4990_s14 = smov 192   ;;  %s423_s13 = int_to_ptr.hbm [resolvable:$true] %s422_s13 }
  0x24   : > { %s4991_s18 = smov 12   ;;  %s5008_s8 = sld [smem:[#allocation33_spill]] }
  0x25   : > { %3911 = dma.hbm_to_vmem [thread:$0]  (!%p4525_p6), %s423_s13, 9216, %s425_s29, [#allocation16], %s4990_s14, %s4990_s14, %s4991_s18  }
  0x26   : > { %s4407_s24 = smov [#allocation11]   ;;  %s4408_s6 = smov [#allocation14]  }
  0x27   : > { %s383_s17 = sshll.u32 %s4407_s24, 4  ;;  %s413_s19 = sshll.u32 %s4408_s6, 4  ;;  %s384_s17 = int_to_ptr.vmem [resolvable:$true] %s383_s17  ;;  %s414_s19 = int_to_ptr.vmem [resolvable:$true] %s413_s19 }
  0x28   : > { %s381_s10 = sshll.u32 %s5007_s5, 4  ;;  %s5009_s11 = sld [smem:[#allocation36_spill]]  ;;  %s382_s10 = int_to_ptr.hbm [resolvable:$true] %s381_s10 }
  0x29   : > { %3902 = dma.hbm_to_vmem [thread:$0]  (!%p4525_p6), %s382_s10, 9216, %s384_s17, [#allocation10], %s4990_s14, %s4990_s14, %s4991_s18  }
  0x2a   : > { %s411_s21 = sshll.u32 %s5008_s8, 4  ;;  %s452_s10 = sshll.u32 %s4988_s12, 4  ;;  %s412_s21 = int_to_ptr.hbm [resolvable:$true] %s411_s21  ;;  %s453_s10 = int_to_ptr.hbm [resolvable:$true] %s452_s10 }
  0x2b   : > { %3908 = dma.hbm_to_vmem [thread:$0]  (!%p4525_p6), %s412_s21, 48, %s414_s19, [#allocation13]  }
  0x2c   : > { %s4409_s2 = smov [#allocation17]   ;;  %s4410_s24 = smov [#allocation18]  }
  0x2d   : > { %s442_s3 = sshll.u32 %s4409_s2, 4  ;;  %s454_s21 = sshll.u32 %s4410_s24, 4  ;;  %s443_s3 = int_to_ptr.vmem [resolvable:$true] %s442_s3  ;;  %s455_s21 = int_to_ptr.vmem [resolvable:$true] %s454_s21 }
  0x2e   : > { %s440_s23 = sshll.u32 %s5009_s11, 4  ;;  %s4570_s17 = sadd.s32 1, %s4399_s28   ;;  %s441_s23 = int_to_ptr.hbm [resolvable:$true] %s440_s23 }
  0x2f   : > { %3914 = dma.hbm_to_vmem [thread:$0]  (!%p4525_p6), %s441_s23, 48, %s443_s3, [#allocation16]  }
  0x30   : > { %3917 = dma.hbm_to_vmem [thread:$0]  (!%p4525_p6), %s453_s10, 48, %s455_s21, [#allocation19]  }
  0x31   : > { %s41_s6 = sadd.s32 1, %s4395_s27  ;;  %s38_s19 = ssub.s32 %s4399_s28, %s4570_s17 }
  0x32   : > { %p48_p7 = scmp.ne.s32.totalorder %s4395_s27, %s4391_s26  ;;  %p39_p8 = scmp.eq.s32.totalorder %s38_s19, 0 }
  0x33   : > { %p49_p9 = scmp.eq.s32.totalorder %s4399_s28, 0  ;;  %p54_p10 = scmp.ne.s32.totalorder %s4391_s26, %s4387_s25 }
  0x34   : > { %p3933_p11 = scmp.lt.s32.totalorder %s4399_s28, 3  ;;  %s4591_s13 = sand.u32 1, %s4395_s27  }
  0x35   : > { %s4582_s20 = scalar_select %p39_p8, %s4395_s27, %s41_s6  }
  0x36   : > { %p50_p12 = por %p49_p9, %p48_p7  ;;  %p4586_p13 = por %p55_p1, %p54_p10 }
  0x37   : > { %s2870_s23 = sshll.u32 %s4399_s28, 1  ;;  %s2869_s29 = sshll.u32 %s4591_s13, 1 }
  0x38   : > { %s473_s10 = scalar_lea.hbm %s4976_s0, %s2870_s23  ;;  %s469_s3 = scalar_lea.vmem [#allocation3], %s2869_s29 }
  0x39   : > { %s475_s2 = sshll.u32 %s473_s10, 4  ;;  %s477_s24 = sshll.u32 %s469_s3, 4  ;;  %s476_s2 = int_to_ptr.hbm [resolvable:$true] %s475_s2  ;;  %s478_s24 = int_to_ptr.vmem [resolvable:$true] %s477_s24 }
  0x3a   : > { %p4600_p0 = pnand %p3933_p11, %p50_p12  ;;  %s3850_s6 = smul.u32 384, %s4591_s13 }
  0x3b   : > { %s484_s19 = sand.u32 1, %s4399_s28   ;;  %s3851_s14 = smul.u32 384, %s4399_s28 }
  0x3c   : > { %s466_s18 = scalar_lea.sflag [#allocation4], %s4591_s13  ;;  %s4249_s5 = sshra.s32 %s476_s2, 4  ;;  %s4250_s5 = int_to_ptr.hbm [resolvable:$true] %s4249_s5 }
  0x3d   : > { %s4251_s30 = scalar_lea.hbm %s4250_s5, 2  ;;  %p4253_p5 = pneg %p4600_p0 }
  0x3e   : > { %p4252_p2 = scmp.ne.s32.totalorder %s4250_s5, %s4251_s30  ;;  %s4256_s25 = scalar_lea.hbm %s4976_s0, 6 }
  0x3f   : > { %p4257_p8 = scmp.lt.s32.totalorder %s4250_s5, %s4976_s0  ;;  %p4258_p9 = scmp.lt.s32.totalorder %s4256_s25, %s4251_s30 }
  0x40   : > { %p4254_p6 = pnand %p4253_p5, %p4252_p2 }
  0x41   : > { %p4259_p10 = por %p4258_p9, %p4257_p8 }
  0x42   : > { %p4255_p7 = pneg %p4254_p6 }
  0x44   : > { %p4260_p11 = pnand %p4259_p10, %p4255_p7 }
  0x46   : > { %4263 = shalt.err (!%p4260_p11)
}
  0x47   : > { %3921 = dma.hbm_to_vmem [thread:$0]  (!%p4600_p0), %s476_s2, 32, %s478_s24, %s466_s18  }
  0x48   : > { %s488_s28 = scalar_lea.vmem [#allocation6], %s3850_s6  ;;  %s494_s23 = scalar_lea.hbm %s4977_s1, %s3851_s14 }
  0x49   : > { %s497_s13 = sshll.u32 %s488_s28, 4  ;;  %s495_s29 = sshll.u32 %s494_s23, 4  ;;  %s498_s13 = int_to_ptr.vmem [resolvable:$true] %s497_s13  ;;  %s496_s29 = int_to_ptr.hbm [resolvable:$true] %s495_s29 }
  0x4a   : > { %s485_s11 = scalar_lea.sflag [#allocation7], %s484_s19  ;;  %s4279_s10 = sshra.s32 %s496_s29, 4  ;;  %s4280_s10 = int_to_ptr.hbm [resolvable:$true] %s4279_s10 }
  0x4b   : > { %s4281_s5 = scalar_lea.hbm %s4280_s10, 384  ;;  %s4286_s2 = scalar_lea.hbm %s4977_s1, 1152 }
  0x4c   : > { %p4282_p12 = scmp.ne.s32.totalorder %s4280_s10, %s4281_s5  ;;  %p4287_p7 = scmp.lt.s32.totalorder %s4280_s10, %s4977_s1 }
  0x4d   : > { %p4288_p8 = scmp.lt.s32.totalorder %s4286_s2, %s4281_s5 }
  0x4e   : > { %p4284_p2 = pnand %p4282_p12, %p4253_p5 }
  0x4f   : > { %p4289_p9 = por %p4288_p8, %p4287_p7 }
  0x50   : > { %p4285_p6 = pneg %p4284_p2 }
  0x52   : > { %p4290_p10 = pnand %p4289_p9, %p4285_p6 }
  0x54   : > { %4293 = shalt.err (!%p4290_p10)
}
  0x55   : > { %s5012_s8 = smov 12   ;;  %s5013_s9 = smov 192  }
  0x56   : > { %3924 = dma.hbm_to_vmem [thread:$0]  (!%p4600_p0), %s496_s29, 6144, %s498_s13, %s485_s11, %s5013_s9, %s5013_s9, %s5012_s8  }
  0x57   : > { %509 = sbr.rel (%p4514_p4) target bundleno = 843 (0x34b), region = 72  ;;  %s511_s14 = sand.u32 (!%p4514_p4), 1, %s4391_s26  }
  0x58   : > { %s2875_s19 = sshll.u32 (!%p4514_p4), %s511_s14, 1  ;;  %s512_s25 = scalar_lea.sflag (!%p4514_p4), [#allocation4], %s511_s14 }
  0x59   : > { %s4641_s3 = scalar_lea.vmem (!%p4514_p4), [#allocation3], %s2875_s19 }
  0x5c   : > { %4354 = dma.done.wait (%p4586_p13), %s512_s25, 32  }
  0x5d   : > { %4356 = vsyncadd (%p4586_p13), %s512_s25, 4294967264  ;;  %s521_s21 = sand.u32 1, %s4508_s15   ;;  %s3852_s28 = smul.u32 384, %s511_s14 }
  0x5e   : > { %s522_s11 = scalar_lea.sflag [#allocation7], %s521_s21 }
  0x5f   : > { %s4648_s13 = scalar_lea.vmem [#allocation6], %s3852_s28 }
  0x60   : > { %4358 = dma.done.wait (%p4586_p13), %s522_s11, 6144  }
  0x61   : > { %4360 = vsyncadd (%p4586_p13), %s522_s11, 4294961152 }
  0x62   : > { %4362 = dma.done.wait (%p55_p1), [#allocation7], 48  }
  0x63   : > { %4364 = vsyncadd (%p55_p1), [#allocation7], 4294967248 }
  0x64   : > { %4366 = dma.done.wait (%p55_p1), [#allocation10], 9264  }
  0x65   : > { %4368 = vsyncadd (%p55_p1), [#allocation10], 4294958032 }
  0x66   : > { %4370 = dma.done.wait (%p55_p1), [#allocation13], 96  }
  0x67   : > { %4372 = vsyncadd (%p55_p1), [#allocation13], 4294967200 }
  0x68   : > { %4374 = dma.done.wait (%p55_p1), [#allocation16], 9264  }
  0x69   : > { %4376 = vsyncadd (%p55_p1), [#allocation16], 4294958032 }
  0x6a   : > { %4378 = dma.done.wait (%p55_p1), [#allocation19], 48  }
  0x6b   : > { %4380 = vsyncadd (%p55_p1), [#allocation19], 4294967248  ;;  %614 = sbr.rel (%p2860_p3) target bundleno = 114 (0x72), region = 116 }
  0x70   : > { %v4411_v0 = vmov 0.0  }
  0x71   : > { %615 = vst [vmem:[#allocation2] sm:$0x3f] %v4411_v0 }
  0x72 PF: > { %v2971_v1 = vld [vmem:[%s4648_s13 + $0xa8] sm:$0xf]  ;;  %v3680_v2 = vld [vmem:[%s4648_s13 + $0xb0] sm:$0xf0]  ;;  %v2959_v6 = vld [vmem:[%s4648_s13 + $0x90] sm:$0xf] }
  0x73   : > { %v3067_v3 = vld [vmem:[%s4648_s13 + $0x168] sm:$0xf]  ;;  %v2972_v4 = vor.u32 %v3680_v2, %v2971_v1  ;;  %v3704_v5 = vld [vmem:[%s4648_s13 + $0x170] sm:$0xf0]  ;;  %v3677_v7 = vld [vmem:[%s4648_s13 + $0x98] sm:$0xf0] }
  0x74   : > { %v3068_v8 = vor.u32 %v3704_v5, %v3067_v3  ;;  %v3055_v9 = vld [vmem:[%s4648_s13 + $0x150] sm:$0xf]  ;;  %v3701_v10 = vld [vmem:[%s4648_s13 + $0x158] sm:$0xf0]  ;;  %v3679_v11 = vld [vmem:[%s4648_s13 + $0xac] sm:$0xf]  ;;  %v2960_v12 = vor.u32 %v3677_v7, %v2959_v6 }
  0x75   : > { %944 = vmatpush.bf16.msra.mxu0 %v2972_v4  ;;  %v2973_v13 = vld [vmem:[%s4648_s13 + $0xb4] sm:$0xf0]  ;;  %v3703_v14 = vld [vmem:[%s4648_s13 + $0x16c] sm:$0xf]  ;;  %v3056_v16 = vor.u32 %v3701_v10, %v3055_v9  ;;  %v3674_v20 = vld [vmem:[%s4648_s13 + $0x80] sm:$0xf0] }
  0x76   : > { %v3069_v15 = vld [vmem:[%s4648_s13 + $0x174] sm:$0xf0]  ;;  %957 = vmatpush.bf16.msra.mxu1 %v3068_v8  ;;  %v2976_v17 = vor.u32 %v3679_v11, %v2973_v13  ;;  %v3698_v22 = vld [vmem:[%s4648_s13 + $0x140] sm:$0xf0]  ;;  %v3676_v23 = vld [vmem:[%s4648_s13 + $0x94] sm:$0xf] }
  0x77   : > { %v3072_v18 = vor.u32 %v3703_v14, %v3069_v15  ;;  %v2947_v19 = vld [vmem:[%s4648_s13 + $0x78] sm:$0xf]  ;;  %v2961_v24 = vld [vmem:[%s4648_s13 + $0x9c] sm:$0xf0]  ;;  %v3700_v26 = vld [vmem:[%s4648_s13 + $0x154] sm:$0xf] }
  0x78   : > { %v3043_v21 = vld [vmem:[%s4648_s13 + $0x138] sm:$0xf]  ;;  %970 = vmatpush.bf16.msra.mxu2 %v2976_v17  ;;  %v2964_v25 = vor.u32 %v3676_v23, %v2961_v24  ;;  %v3057_v27 = vld [vmem:[%s4648_s13 + $0x15c] sm:$0xf0]  ;;  %v2948_v28 = vor.u32 %v3674_v20, %v2947_v19  ;;  %v3671_v31 = vld [vmem:[%s4648_s13 + $0x68] sm:$0xf0] }
  0x79   : > { %983 = vmatpush.bf16.msra.mxu3 %v3072_v18  ;;  %945 = vmatpush.bf16.msra.mxu0 %v2960_v12  ;;  %v3060_v29 = vor.u32 %v3700_v26, %v3057_v27  ;;  %v2935_v30 = vld [vmem:[%s4648_s13 + $0x60] sm:$0xf]  ;;  %v3044_v32 = vor.u32 %v3698_v22, %v3043_v21  ;;  %v3673_v33 = vld [vmem:[%s4648_s13 + $0x7c] sm:$0xf]  ;;  %v2949_v34 = vld [vmem:[%s4648_s13 + $0x84] sm:$0xf0] }
  0x7a   : > { %958 = vmatpush.bf16.msra.mxu1 %v3056_v16  ;;  %v3697_v35 = vld [vmem:[%s4648_s13 + $0x13c] sm:$0xf]  ;;  %v3031_v36 = vld [vmem:[%s4648_s13 + $0x120] sm:$0xf]  ;;  %v3695_v37 = vld [vmem:[%s4648_s13 + $0x128] sm:$0xf0]  ;;  %v2952_v39 = vor.u32 %v3673_v33, %v2949_v34  ;;  %v2936_v42 = vor.u32 %v3671_v31, %v2935_v30 }
  0x7b   : > { %v3045_v38 = vld [vmem:[%s4648_s13 + $0x144] sm:$0xf0]  ;;  %v3670_v41 = vld [vmem:[%s4648_s13 + $0x64] sm:$0xf]  ;;  %v2937_v43 = vld [vmem:[%s4648_s13 + $0x6c] sm:$0xf0]  ;;  %v3032_v46 = vor.u32 %v3695_v37, %v3031_v36 }
  0x7c   : > { %971 = vmatpush.bf16.msra.mxu2 %v2964_v25  ;;  %v3048_v40 = vor.u32 %v3697_v35, %v3045_v38  ;;  %v3694_v44 = vld [vmem:[%s4648_s13 + $0x124] sm:$0xf]  ;;  %v3033_v45 = vld [vmem:[%s4648_s13 + $0x12c] sm:$0xf0]  ;;  %v2923_v47 = vld [vmem:[%s4648_s13 + $0x48] sm:$0xf]  ;;  %v2940_v51 = vor.u32 %v3670_v41, %v2937_v43 }
  0x7d   : > { %984 = vmatpush.bf16.msra.mxu3 %v3060_v29  ;;  %946 = vmatpush.bf16.msra.mxu0 %v2948_v28  ;;  %v3668_v48 = vld [vmem:[%s4648_s13 + $0x50] sm:$0xf0]  ;;  %v3019_v49 = vld [vmem:[%s4648_s13 + $0x108] sm:$0xf]  ;;  %v3036_v52 = vor.u32 %v3694_v44, %v3033_v45  ;;  %v3667_v53 = vld [vmem:[%s4648_s13 + $0x4c] sm:$0xf] }
  0x7e   : > { %959 = vmatpush.bf16.msra.mxu1 %v3044_v32  ;;  %v3692_v50 = vld [vmem:[%s4648_s13 + $0x110] sm:$0xf0]  ;;  %v2924_v54 = vor.u32 %v3668_v48, %v2923_v47  ;;  %v2925_v55 = vld [vmem:[%s4648_s13 + $0x54] sm:$0xf0]  ;;  %v3691_v56 = vld [vmem:[%s4648_s13 + $0x10c] sm:$0xf] }
  0x7f   : > { %v3021_v57 = vld [vmem:[%s4648_s13 + $0x114] sm:$0xf0]  ;;  %v3020_v58 = vor.u32 %v3692_v50, %v3019_v49  ;;  %v2911_v59 = vld [vmem:[%s4648_s13 + $0x30] sm:$0xf]  ;;  %v3665_v60 = vld [vmem:[%s4648_s13 + $0x38] sm:$0xf0]  ;;  %v2928_v63 = vor.u32 %v3667_v53, %v2925_v55 }
  0x80   : > { %972 = vmatpush.bf16.msra.mxu2 %v2952_v39  ;;  %v3007_v61 = vld [vmem:[%s4648_s13 + $0xf0] sm:$0xf]  ;;  %v3689_v62 = vld [vmem:[%s4648_s13 + $0xf8] sm:$0xf0]  ;;  %v3024_v0 = vor.u32 %v3691_v56, %v3021_v57  ;;  %v3664_v1 = vld [vmem:[%s4648_s13 + $0x34] sm:$0xf]  ;;  %v2912_v2 = vor.u32 %v3665_v60, %v2911_v59 }
  0x81   : > { %985 = vmatpush.bf16.msra.mxu3 %v3048_v40  ;;  %947 = vmatpush.bf16.msra.mxu0 %v2936_v42  ;;  %v2913_v3 = vld [vmem:[%s4648_s13 + $0x3c] sm:$0xf0]  ;;  %v3688_v4 = vld [vmem:[%s4648_s13 + $0xf4] sm:$0xf]  ;;  %v3008_v6 = vor.u32 %v3689_v62, %v3007_v61  ;;  %v2899_v7 = vld [vmem:[%s4648_s13 + $0x18] sm:$0xf] }
  0x82   : > { %960 = vmatpush.bf16.msra.mxu1 %v3032_v46  ;;  %v3009_v5 = vld [vmem:[%s4648_s13 + $0xfc] sm:$0xf0]  ;;  %v3662_v8 = vld [vmem:[%s4648_s13 + $0x20] sm:$0xf0]  ;;  %v2995_v9 = vld [vmem:[%s4648_s13 + $0xd8] sm:$0xf]  ;;  %v2916_v11 = vor.u32 %v3664_v1, %v2913_v3 }
  0x83   : > { %v3686_v10 = vld [vmem:[%s4648_s13 + $0xe0] sm:$0xf0]  ;;  %v3012_v12 = vor.u32 %v3688_v4, %v3009_v5  ;;  %v2887_v13 = vld [vmem:[%s4648_s13] sm:$0xf]  ;;  %v3659_v14 = vld [vmem:[%s4648_s13 + $0x8] sm:$0xf0]  ;;  %v2900_v16 = vor.u32 %v3662_v8, %v2899_v7 }
  0x84   : > { %973 = vmatpush.bf16.msra.mxu2 %v2940_v51  ;;  %v3661_v15 = vld [vmem:[%s4648_s13 + $0x1c] sm:$0xf]  ;;  %v2901_v17 = vld [vmem:[%s4648_s13 + $0x24] sm:$0xf0]  ;;  %v2996_v20 = vor.u32 %v3686_v10, %v2995_v9  ;;  %v2983_v21 = vld [vmem:[%s4648_s13 + $0xc0] sm:$0xf]  ;;  %v2888_v31 = vor.u32 %v3659_v14, %v2887_v13 }
  0x85   : > { %986 = vmatpush.bf16.msra.mxu3 %v3036_v52  ;;  %948 = vmatpush.bf16.msra.mxu0 %v2924_v54  ;;  %v3685_v18 = vld [vmem:[%s4648_s13 + $0xdc] sm:$0xf]  ;;  %v2997_v19 = vld [vmem:[%s4648_s13 + $0xe4] sm:$0xf0]  ;;  %v3683_v22 = vld [vmem:[%s4648_s13 + $0xc8] sm:$0xf0]  ;;  %v2904_v26 = vor.u32 %v3661_v15, %v2901_v17 }
  0x86   : > { %961 = vmatpush.bf16.msra.mxu1 %v3020_v58  ;;  %v617_v23 = vld [vmem:[%s4641_s3] sm:$0x3]  ;;  %v2979_v24 = vld [vmem:[%s4648_s13 + $0xb0] sm:$0xf]  ;;  %v3000_v27 = vor.u32 %v3685_v18, %v2997_v19  ;;  %v3658_v30 = vld [vmem:[%s4648_s13 + $0x4] sm:$0xf]  ;;  %v2984_v35 = vor.u32 %v3683_v22, %v2983_v21 }
  0x87   : > { %v3681_v25 = vld [vmem:[%s4648_s13 + $0xb8] sm:$0xf0]  ;;  %683 = vst [vmem:[#allocation1] ss:$9 sm:$0xff] %v617_v23  ;;  %v3075_v28 = vld [vmem:[%s4648_s13 + $0x170] sm:$0xf] }
  0x88   : > { %974 = vmatpush.bf16.msra.mxu2 %v2928_v63  ;;  %v3705_v29 = vld [vmem:[%s4648_s13 + $0x178] sm:$0xf0]  ;;  %v2889_v32 = vld [vmem:[%s4648_s13 + $0xc] sm:$0xf0]  ;;  %v3682_v33 = vld [vmem:[%s4648_s13 + $0xc4] sm:$0xf]  ;;  %v2980_v36 = vor.u32 %v3681_v25, %v2979_v24 }
  0x89   : > { %987 = vmatpush.bf16.msra.mxu3 %v3024_v0  ;;  %949 = vmatpush.bf16.msra.mxu0 %v2912_v2  ;;  %v2985_v34 = vld [vmem:[%s4648_s13 + $0xcc] sm:$0xf0]  ;;  %v3076_v37 = vor.u32 %v3705_v29, %v3075_v28  ;;  %v2967_v38 = vld [vmem:[%s4648_s13 + $0x98] sm:$0xf]  ;;  %v3678_v39 = vld [vmem:[%s4648_s13 + $0xa0] sm:$0xf0]  ;;  %v2892_v40 = vor.u32 %v3658_v30, %v2889_v32 }
  0x8a   : > { %962 = vmatpush.bf16.msra.mxu1 %v3008_v6  ;;  %v2988_v41 = vor.u32 %v3682_v33, %v2985_v34  ;;  %v3063_v42 = vld [vmem:[%s4648_s13 + $0x158] sm:$0xf]  ;;  %v3702_v43 = vld [vmem:[%s4648_s13 + $0x160] sm:$0xf0]  ;;  %v2968_v44 = vor.u32 %v3678_v39, %v2967_v38  ;;  %v2955_v48 = vld [vmem:[%s4648_s13 + $0x80] sm:$0xf] }
  0x8b   : > { %v3064_v47 = vor.u32 %v3702_v43, %v3063_v42  ;;  %v3675_v49 = vld [vmem:[%s4648_s13 + $0x88] sm:$0xf0]  ;;  %v3051_v50 = vld [vmem:[%s4648_s13 + $0x140] sm:$0xf]  ;;  %v2943_v54 = vld [vmem:[%s4648_s13 + $0x68] sm:$0xf] }
  0x8c   : > { %975 = vmatpush.bf16.msra.mxu2 %v2916_v11  ;;  %v3699_v51 = vld [vmem:[%s4648_s13 + $0x148] sm:$0xf0]  ;;  %v2956_v52 = vor.u32 %v3675_v49, %v2955_v48  ;;  %v3672_v55 = vld [vmem:[%s4648_s13 + $0x70] sm:$0xf0]  ;;  %v3039_v56 = vld [vmem:[%s4648_s13 + $0x128] sm:$0xf] }
  0x8d   : > { %988 = vmatpush.bf16.msra.mxu3 %v3012_v12  ;;  %950 = vmatpush.bf16.msra.mxu0 %v2900_v16  ;;  %v3052_v53 = vor.u32 %v3699_v51, %v3051_v50  ;;  %v3696_v57 = vld [vmem:[%s4648_s13 + $0x130] sm:$0xf0]  ;;  %v2944_v58 = vor.u32 %v3672_v55, %v2943_v54  ;;  %v2931_v60 = vld [vmem:[%s4648_s13 + $0x50] sm:$0xf]  ;;  %v3669_v61 = vld [vmem:[%s4648_s13 + $0x58] sm:$0xf0] }
  0x8e   : > { %963 = vmatpush.bf16.msra.mxu1 %v2996_v20  ;;  %v684_v45 = vld [vmem:[#allocation1] sm:$0xff]  ;;  %v685_v46 = vld [vmem:[#allocation1 + $0x9] sm:$0xff]  ;;  %v3040_v59 = vor.u32 %v3696_v57, %v3039_v56  ;;  %v2932_v0 = vor.u32 %v3669_v61, %v2931_v60  ;;  %v3666_v3 = vld [vmem:[%s4648_s13 + $0x40] sm:$0xf0]  ;;  %vm1027_vm0 = vcmask 1041408   ;;  %vm1029_vm1 = vcmask 1043456  }
  0x8f   : > { %v3027_v62 = vld [vmem:[%s4648_s13 + $0x110] sm:$0xf]  ;;  %v3693_v63 = vld [vmem:[%s4648_s13 + $0x118] sm:$0xf0]  ;;  %v2919_v2 = vld [vmem:[%s4648_s13 + $0x38] sm:$0xf] }
  0x90   : > { %976 = vmatpush.bf16.msra.mxu2 %v2904_v26  ;;  %v3028_v1 = vor.u32 %v3693_v63, %v3027_v62  ;;  %v3015_v4 = vld [vmem:[%s4648_s13 + $0xf8] sm:$0xf]  ;;  %v3690_v5 = vld [vmem:[%s4648_s13 + $0x100] sm:$0xf0]  ;;  %v2920_v6 = vor.u32 %v3666_v3, %v2919_v2  ;;  %v2907_v8 = vld [vmem:[%s4648_s13 + $0x20] sm:$0xf] }
  0x91   : > { %989 = vmatpush.bf16.msra.mxu3 %v3000_v27  ;;  %951 = vmatpush.bf16.msra.mxu0 %v2888_v31  ;;  %v3016_v7 = vor.u32 %v3690_v5, %v3015_v4  ;;  %v3663_v9 = vld [vmem:[%s4648_s13 + $0x28] sm:$0xf0]  ;;  %v3003_v10 = vld [vmem:[%s4648_s13 + $0xe0] sm:$0xf]  ;;  %v2895_v14 = vld [vmem:[%s4648_s13 + $0x8] sm:$0xf] }
  0x92   : > { %964 = vmatpush.bf16.msra.mxu1 %v2984_v35  ;;  %v3687_v11 = vld [vmem:[%s4648_s13 + $0xe8] sm:$0xf0]  ;;  %v2908_v12 = vor.u32 %v3663_v9, %v2907_v8  ;;  %v3660_v15 = vld [vmem:[%s4648_s13 + $0x10] sm:$0xf0]  ;;  %v2991_v16 = vld [vmem:[%s4648_s13 + $0xc8] sm:$0xf] }
  0x93   : > { %v3004_v13 = vor.u32 %v3687_v11, %v3003_v10  ;;  %v3684_v17 = vld [vmem:[%s4648_s13 + $0xd0] sm:$0xf0]  ;;  %v2896_v18 = vor.u32 %v3660_v15, %v2895_v14  ;;  %p3077_p1 = scmp.ne.s32.totalorder %s4508_s15, 2 }
  0x94   : > { %977 = vmatpush.bf16.msra.mxu2 %v2892_v40  ;;  %952 = vmatmul.bf16.vlgmr.msra.gmra.mxu0 %v684_v45  ;;  %v2992_v19 = vor.u32 %v3684_v17, %v2991_v16  ;;  %v616_v34 = vld [vmem:[#allocation2] sm:$0x3f]  ;;  %s5016_s30 = sld [smem:[#allocation35_spill]] (!%p3077_p1) }
  0x95   : > { %996 = vmatpush.bf16.msrb.mxu0 %v2980_v36  ;;  %990 = vmatpush.bf16.msra.mxu3 %v2988_v41 }
  0x96   : > { %1009 = vmatpush.bf16.msrb.mxu1 %v3076_v37 }
  0x97   : > { %965 = vmatmul.bf16.vlgmr.msra.gmra.mxu1 %v685_v46  ;;  %978 = vmatmul.bf16.vlgmr.msra.gmra.mxu2 %v684_v45 }
  0x98   : > { %991 = vmatmul.bf16.vlgmr.msra.gmra.mxu3 %v685_v46 }
  0x99   : > { %997 = vmatpush.bf16.msrb.mxu0 %v2968_v44 }
  0x9a   : > { %1010 = vmatpush.bf16.msrb.mxu1 %v3064_v47 }
  0x9d   : > { %998 = vmatpush.bf16.msrb.mxu0 %v2956_v52 }
  0x9e   : > { %1011 = vmatpush.bf16.msrb.mxu1 %v3052_v53 }
  0xa1   : > { %999 = vmatpush.bf16.msrb.mxu0 %v2944_v58 }
  0xa2   : > { %1012 = vmatpush.bf16.msrb.mxu1 %v3040_v59 }
  0xa5   : > { %1000 = vmatpush.bf16.msrb.mxu0 %v2932_v0 }
  0xa6   : > { %1013 = vmatpush.bf16.msrb.mxu1 %v3028_v1 }
  0xa9   : > { %1001 = vmatpush.bf16.msrb.mxu0 %v2920_v6 }
  0xaa   : > { %1014 = vmatpush.bf16.msrb.mxu1 %v3016_v7 }
  0xad   : > { %1002 = vmatpush.bf16.msrb.mxu0 %v2908_v12 }
  0xae   : > { %1015 = vmatpush.bf16.msrb.mxu1 %v3004_v13 }
  0xb1   : > { %1003 = vmatpush.bf16.msrb.mxu0 %v2896_v18 }
  0xb2   : > { %1016 = vmatpush.bf16.msrb.mxu1 %v2992_v19 }
  0xb4   : > { %1004 = vmatmul.bf16.vlgmr.msrb.gmra.mxu0 %v684_v45 }
  0xb5   : > { %1017 = vmatmul.bf16.vlgmr.msrb.gmra.mxu1 %v685_v46 }
 0x111   : > { %v953_v20 = vpop.f32.mrf.mxu0 }
 0x114   : > { %v966_v21 = vpop.f32.mrf.mxu1 }
 0x115   : > { %v967_v30 = vadd.f32 %v966_v21, %v953_v20 }
 0x119   : > { %v955_v23 = vpop.f32.mrf.mxu0 }
 0x11a   : > { %v979_v22 = vpop.f32.mrf.mxu2 }
 0x11b   : > { %v992_v24 = vpop.f32.mrf.mxu3 }
 0x11c   : > { %v968_v25 = vpop.f32.mrf.mxu1  ;;  %v993_v28 = vadd.f32 %v992_v24, %v979_v22 }
 0x11e   : > { %v1025_v31 = vrot.slane %v993_v28, 6 }
 0x120   : > { %v1028_v36 = vsel %vm1027_vm0, %v967_v30, %v1025_v31 }
 0x122   : > { %v981_v26 = vpop.f32.mrf.mxu2 }
 0x123   : > { %v994_v27 = vpop.f32.mrf.mxu3 }
 0x131   : > { %v1005_v29 = vpop.f32.mrf.mxu0 }
 0x132   : > { %v1018_v32 = vpop.f32.mrf.mxu1 }
 0x133   : > { %v1019_v33 = vadd.f32 %v1018_v32, %v1005_v29 }
 0x135   : > { %v1026_v35 = vrot.slane %v1019_v33, 4 }
 0x136   : > { %1037 = sbr.rel (%p3077_p1) target bundleno = 832 (0x340), region = 120 }
 0x137   : > { %v1030_v37 = vsel %vm1029_vm1, %v1028_v36, %v1026_v35 }
 0x138   : > { %v1032_v38 = vadd.f32 %v1030_v37, %v616_v34 }
 0x139   : > { %v1007_v39 = vpop.f32.mrf.mxu0 }
 0x13a   : > { %1033 = vst [vmem:[#allocation2] sm:$0x3f] %v1032_v38  ;;  %v1020_v40 = vpop.f32.mrf.mxu1 }
 0x13b   : > { %v3164_v41 = vld [vmem:[#allocation11 + $0xa8] sm:$0xf]  ;;  %v3728_v42 = vld [vmem:[#allocation11 + $0xb0] sm:$0xf0]  ;;  %v3152_v43 = vld [vmem:[#allocation11 + $0x90] sm:$0xf] }
 0x13c   : > { %v3165_v44 = vor.u32 %v3728_v42, %v3164_v41  ;;  %v3725_v45 = vld [vmem:[#allocation11 + $0x98] sm:$0xf0]  ;;  %v3140_v46 = vld [vmem:[#allocation11 + $0x78] sm:$0xf]  ;;  %v3356_v47 = vld [vmem:[#allocation11 + $0x228] sm:$0xf] }
 0x13d   : > { %v3153_v48 = vor.u32 %v3725_v45, %v3152_v43  ;;  %v3776_v49 = vld [vmem:[#allocation11 + $0x230] sm:$0xf0]  ;;  %v3727_v50 = vld [vmem:[#allocation11 + $0xac] sm:$0xf]  ;;  %v3166_v51 = vld [vmem:[#allocation11 + $0xb4] sm:$0xf0] }
 0x13e   : > { %1706 = vmatpush.bf16.msra.mxu0 %v3165_v44  ;;  %v3722_v52 = vld [vmem:[#allocation11 + $0x80] sm:$0xf0]  ;;  %v3357_v53 = vor.u32 %v3776_v49, %v3356_v47  ;;  %v3169_v54 = vor.u32 %v3727_v50, %v3166_v51  ;;  %v3260_v55 = vld [vmem:[#allocation11 + $0x168] sm:$0xf]  ;;  %v3752_v56 = vld [vmem:[#allocation11 + $0x170] sm:$0xf0] }
 0x13f   : > { %v3261_v57 = vor.u32 %v3752_v56, %v3260_v55  ;;  %v3344_v58 = vld [vmem:[#allocation11 + $0x210] sm:$0xf]  ;;  %v3773_v59 = vld [vmem:[#allocation11 + $0x218] sm:$0xf0]  ;;  %v3724_v61 = vld [vmem:[#allocation11 + $0x94] sm:$0xf]  ;;  %v3141_v0 = vor.u32 %v3722_v52, %v3140_v46 }
 0x140   : > { %1732 = vmatpush.bf16.msra.mxu2 %v3357_v53  ;;  %1745 = vmatpush.bf16.msra.mxu3 %v3169_v54  ;;  %v3345_v60 = vor.u32 %v3773_v59, %v3344_v58  ;;  %v3154_v62 = vld [vmem:[#allocation11 + $0x9c] sm:$0xf0]  ;;  %v3248_v63 = vld [vmem:[#allocation11 + $0x150] sm:$0xf]  ;;  %v3719_v2 = vld [vmem:[#allocation11 + $0x68] sm:$0xf0] }
 0x141   : > { %v3128_v1 = vld [vmem:[#allocation11 + $0x60] sm:$0xf]  ;;  %1719 = vmatpush.bf16.msra.mxu1 %v3261_v57  ;;  %v3157_v3 = vor.u32 %v3724_v61, %v3154_v62  ;;  %v3749_v4 = vld [vmem:[#allocation11 + $0x158] sm:$0xf0]  ;;  %v3332_v6 = vld [vmem:[#allocation11 + $0x1f8] sm:$0xf] }
 0x142   : > { %1707 = vmatpush.bf16.msra.mxu0 %v3153_v48  ;;  %v3249_v5 = vor.u32 %v3749_v4, %v3248_v63  ;;  %v3770_v7 = vld [vmem:[#allocation11 + $0x200] sm:$0xf0]  ;;  %v3721_v8 = vld [vmem:[#allocation11 + $0x7c] sm:$0xf]  ;;  %v3142_v9 = vld [vmem:[#allocation11 + $0x84] sm:$0xf0]  ;;  %v3129_v16 = vor.u32 %v3719_v2, %v3128_v1 }
 0x143   : > { %v3236_v10 = vld [vmem:[#allocation11 + $0x138] sm:$0xf]  ;;  %v3746_v11 = vld [vmem:[#allocation11 + $0x140] sm:$0xf0]  ;;  %v3116_v12 = vld [vmem:[#allocation11 + $0x48] sm:$0xf]  ;;  %v3333_v13 = vor.u32 %v3770_v7, %v3332_v6  ;;  %v3145_v14 = vor.u32 %v3721_v8, %v3142_v9 }
 0x144   : > { %1733 = vmatpush.bf16.msra.mxu2 %v3345_v60  ;;  %1746 = vmatpush.bf16.msra.mxu3 %v3157_v3  ;;  %v3320_v15 = vld [vmem:[#allocation11 + $0x1e0] sm:$0xf]  ;;  %v3237_v17 = vor.u32 %v3746_v11, %v3236_v10  ;;  %v3767_v18 = vld [vmem:[#allocation11 + $0x1e8] sm:$0xf0]  ;;  %v3718_v19 = vld [vmem:[#allocation11 + $0x64] sm:$0xf] }
 0x145   : > { %1720 = vmatpush.bf16.msra.mxu1 %v3249_v5  ;;  %v3130_v20 = vld [vmem:[#allocation11 + $0x6c] sm:$0xf0]  ;;  %v3716_v21 = vld [vmem:[#allocation11 + $0x50] sm:$0xf0]  ;;  %v3224_v22 = vld [vmem:[#allocation11 + $0x120] sm:$0xf]  ;;  %v3321_v25 = vor.u32 %v3767_v18, %v3320_v15 }
 0x146   : > { %1708 = vmatpush.bf16.msra.mxu0 %v3141_v0  ;;  %v3743_v23 = vld [vmem:[#allocation11 + $0x128] sm:$0xf0]  ;;  %v3104_v24 = vld [vmem:[#allocation11 + $0x30] sm:$0xf]  ;;  %v3133_v26 = vor.u32 %v3718_v19, %v3130_v20  ;;  %v3308_v27 = vld [vmem:[#allocation11 + $0x1c8] sm:$0xf]  ;;  %v3117_v28 = vor.u32 %v3716_v21, %v3116_v12 }
 0x147   : > { %v3225_v29 = vor.u32 %v3743_v23, %v3224_v22  ;;  %v3764_v30 = vld [vmem:[#allocation11 + $0x1d0] sm:$0xf0]  ;;  %v3715_v31 = vld [vmem:[#allocation11 + $0x4c] sm:$0xf]  ;;  %v3118_v32 = vld [vmem:[#allocation11 + $0x54] sm:$0xf0] }
 0x148   : > { %1734 = vmatpush.bf16.msra.mxu2 %v3333_v13  ;;  %1747 = vmatpush.bf16.msra.mxu3 %v3145_v14  ;;  %v3713_v33 = vld [vmem:[#allocation11 + $0x38] sm:$0xf0]  ;;  %v3212_v34 = vld [vmem:[#allocation11 + $0x108] sm:$0xf]  ;;  %v3740_v35 = vld [vmem:[#allocation11 + $0x110] sm:$0xf0]  ;;  %v3309_v37 = vor.u32 %v3764_v30, %v3308_v27  ;;  %v3121_v38 = vor.u32 %v3715_v31, %v3118_v32 }
 0x149   : > { %1721 = vmatpush.bf16.msra.mxu1 %v3237_v17  ;;  %v3092_v36 = vld [vmem:[#allocation11 + $0x18] sm:$0xf]  ;;  %v3296_v39 = vld [vmem:[#allocation11 + $0x1b0] sm:$0xf]  ;;  %v3105_v40 = vor.u32 %v3713_v33, %v3104_v24  ;;  %v3213_v41 = vor.u32 %v3740_v35, %v3212_v34  ;;  %v3761_v42 = vld [vmem:[#allocation11 + $0x1b8] sm:$0xf0] }
 0x14a   : > { %1709 = vmatpush.bf16.msra.mxu0 %v3129_v16  ;;  %v3712_v43 = vld [vmem:[#allocation11 + $0x34] sm:$0xf]  ;;  %v3106_v44 = vld [vmem:[#allocation11 + $0x3c] sm:$0xf0]  ;;  %v3710_v45 = vld [vmem:[#allocation11 + $0x20] sm:$0xf0]  ;;  %v3297_v49 = vor.u32 %v3761_v42, %v3296_v39 }
 0x14b   : > { %v3200_v46 = vld [vmem:[#allocation11 + $0xf0] sm:$0xf]  ;;  %v3737_v47 = vld [vmem:[#allocation11 + $0xf8] sm:$0xf0]  ;;  %v3080_v48 = vld [vmem:[#allocation11] sm:$0xf]  ;;  %v3109_v50 = vor.u32 %v3712_v43, %v3106_v44  ;;  %v3093_v52 = vor.u32 %v3710_v45, %v3092_v36 }
 0x14c   : > { %1735 = vmatpush.bf16.msra.mxu2 %v3321_v25  ;;  %1748 = vmatpush.bf16.msra.mxu3 %v3133_v26  ;;  %v3284_v51 = vld [vmem:[#allocation11 + $0x198] sm:$0xf]  ;;  %v3201_v53 = vor.u32 %v3737_v47, %v3200_v46  ;;  %v3758_v54 = vld [vmem:[#allocation11 + $0x1a0] sm:$0xf0]  ;;  %v3709_v55 = vld [vmem:[#allocation11 + $0x1c] sm:$0xf] }
 0x14d   : > { %1722 = vmatpush.bf16.msra.mxu1 %v3225_v29  ;;  %v3094_v56 = vld [vmem:[#allocation11 + $0x24] sm:$0xf0]  ;;  %v3707_v57 = vld [vmem:[#allocation11 + $0x8] sm:$0xf0]  ;;  %v3188_v58 = vld [vmem:[#allocation11 + $0xd8] sm:$0xf]  ;;  %v3285_v62 = vor.u32 %v3758_v54, %v3284_v51 }
 0x14e   : > { %1710 = vmatpush.bf16.msra.mxu0 %v3117_v28  ;;  %v3734_v59 = vld [vmem:[#allocation11 + $0xe0] sm:$0xf0]  ;;  %v3751_v60 = vld [vmem:[#allocation11 + $0x16c] sm:$0xf]  ;;  %v3262_v61 = vld [vmem:[#allocation11 + $0x174] sm:$0xf0]  ;;  %v3097_v63 = vor.u32 %v3709_v55, %v3094_v56  ;;  %v3081_v2 = vor.u32 %v3707_v57, %v3080_v48 }
 0x14f   : > { %v3272_v0 = vld [vmem:[#allocation11 + $0x180] sm:$0xf]  ;;  %v3755_v1 = vld [vmem:[#allocation11 + $0x188] sm:$0xf0]  ;;  %v3748_v3 = vld [vmem:[#allocation11 + $0x154] sm:$0xf]  ;;  %v3189_v4 = vor.u32 %v3734_v59, %v3188_v58  ;;  %v3265_v8 = vor.u32 %v3751_v60, %v3262_v61 }
 0x150   : > { %1736 = vmatpush.bf16.msra.mxu2 %v3309_v37  ;;  %1749 = vmatpush.bf16.msra.mxu3 %v3121_v38  ;;  %v3706_v5 = vld [vmem:[#allocation11 + $0x4] sm:$0xf]  ;;  %v3082_v6 = vld [vmem:[#allocation11 + $0xc] sm:$0xf0]  ;;  %v3729_v9 = vld [vmem:[#allocation11 + $0xb8] sm:$0xf0]  ;;  %v3273_v15 = vor.u32 %v3755_v1, %v3272_v0 }
 0x151   : > { %1723 = vmatpush.bf16.msra.mxu1 %v3213_v41  ;;  %v3172_v7 = vld [vmem:[#allocation11 + $0xb0] sm:$0xf]  ;;  %v3753_v11 = vld [vmem:[#allocation11 + $0x178] sm:$0xf0]  ;;  %v3250_v12 = vld [vmem:[#allocation11 + $0x15c] sm:$0xf0]  ;;  %v3085_v16 = vor.u32 %v3706_v5, %v3082_v6 }
 0x152   : > { %1711 = vmatpush.bf16.msra.mxu0 %v3105_v40  ;;  %v3268_v10 = vld [vmem:[#allocation11 + $0x170] sm:$0xf]  ;;  %v3176_v13 = vld [vmem:[#allocation11 + $0xc0] sm:$0xf]  ;;  %v3731_v14 = vld [vmem:[#allocation11 + $0xc8] sm:$0xf0]  ;;  %v3173_v20 = vor.u32 %v3729_v9, %v3172_v7  ;;  %v3253_v25 = vor.u32 %v3748_v3, %v3250_v12 }
 0x153   : > { %v3775_v17 = vld [vmem:[#allocation11 + $0x22c] sm:$0xf]  ;;  %v3358_v18 = vld [vmem:[#allocation11 + $0x234] sm:$0xf0]  ;;  %v3269_v21 = vor.u32 %v3753_v11, %v3268_v10  ;;  %v3726_v22 = vld [vmem:[#allocation11 + $0xa0] sm:$0xf0]  ;;  %v3177_v26 = vor.u32 %v3731_v14, %v3176_v13 }
 0x154   : > { %1737 = vmatpush.bf16.msra.mxu2 %v3297_v49  ;;  %1750 = vmatpush.bf16.msra.mxu3 %v3109_v50  ;;  %v3160_v19 = vld [vmem:[#allocation11 + $0x98] sm:$0xf]  ;;  %v3750_v24 = vld [vmem:[#allocation11 + $0x160] sm:$0xf0]  ;;  %v3745_v27 = vld [vmem:[#allocation11 + $0x13c] sm:$0xf]  ;;  %v3361_v29 = vor.u32 %v3775_v17, %v3358_v18 }
 0x155   : > { %1724 = vmatpush.bf16.msra.mxu1 %v3201_v53  ;;  %v3256_v23 = vld [vmem:[#allocation11 + $0x158] sm:$0xf]  ;;  %v3238_v28 = vld [vmem:[#allocation11 + $0x144] sm:$0xf0]  ;;  %v3161_v30 = vor.u32 %v3726_v22, %v3160_v19  ;;  %v3772_v32 = vld [vmem:[#allocation11 + $0x214] sm:$0xf] }
 0x156   : > { %1712 = vmatpush.bf16.msra.mxu0 %v3093_v52  ;;  %v3257_v31 = vor.u32 %v3750_v24, %v3256_v23  ;;  %v3346_v33 = vld [vmem:[#allocation11 + $0x21c] sm:$0xf0]  ;;  %v1039_v34 = vld [vmem:[#allocation8] sm:$0x7]  ;;  %v3241_v39 = vor.u32 %v3745_v27, %v3238_v28  ;;  %v3723_v40 = vld [vmem:[#allocation11 + $0x88] sm:$0xf0] }
 0x157   : > { %v3148_v35 = vld [vmem:[#allocation11 + $0x80] sm:$0xf]  ;;  %v1041_v36 = vperm.slane %v1039_v34, 0  ;;  %v1042_v37 = vperm.slane %v1039_v34, 1  ;;  %v1043_v38 = vperm.slane %v1039_v34, 2  ;;  %v4412_v43 = vmov 2.0  }
 0x158   : > { %1738 = vmatpush.bf16.msra.mxu2 %v3285_v62  ;;  %1751 = vmatpush.bf16.msra.mxu3 %v3097_v63  ;;  %v3244_v41 = vld [vmem:[#allocation11 + $0x140] sm:$0xf]  ;;  %v3747_v42 = vld [vmem:[#allocation11 + $0x148] sm:$0xf0]  ;;  %3989 = vrcp.f32 %v4412_v43  ;;  %v3742_v44 = vld [vmem:[#allocation11 + $0x124] sm:$0xf]  ;;  %v3349_v46 = vor.u32 %v3772_v32, %v3346_v33  ;;  %v3149_v52 = vor.u32 %v3723_v40, %v3148_v35 }
 0x159   : > { %1725 = vmatpush.bf16.msra.mxu1 %v3189_v4  ;;  %v3226_v45 = vld [vmem:[#allocation11 + $0x12c] sm:$0xf0]  ;;  %v1044_v47 = vrot.slane %v1042_v37, 6  ;;  %v1045_v48 = vrot.slane %v1043_v38, 4  ;;  %v3769_v49 = vld [vmem:[#allocation11 + $0x1fc] sm:$0xf]  ;;  %v3245_v53 = vor.u32 %v3747_v42, %v3244_v41 }
 0x15a   : > { %1713 = vmatpush.bf16.msra.mxu0 %v3081_v2  ;;  %v3334_v50 = vld [vmem:[#allocation11 + $0x204] sm:$0xf0]  ;;  %v1038_v51 = vld [vmem:[#allocation2] sm:$0x3f]  ;;  %v3229_v56 = vor.u32 %v3742_v44, %v3226_v45  ;;  %v3720_v57 = vld [vmem:[#allocation11 + $0x70] sm:$0xf0] }
 0x15b   : > { %v3136_v54 = vld [vmem:[#allocation11 + $0x68] sm:$0xf]  ;;  %v1046_v55 = vsel %vm1027_vm0, %v1041_v36, %v1044_v47  ;;  %v3744_v59 = vld [vmem:[#allocation11 + $0x130] sm:$0xf0]  ;;  %v3739_v61 = vld [vmem:[#allocation11 + $0x10c] sm:$0xf]  ;;  %v3337_v63 = vor.u32 %v3769_v49, %v3334_v50 }
 0x15c   : > { %1739 = vmatpush.bf16.msra.mxu2 %v3273_v15  ;;  %1752 = vmatpush.bf16.msra.mxu3 %v3085_v16  ;;  %v3232_v58 = vld [vmem:[#allocation11 + $0x128] sm:$0xf]  ;;  %v1047_v60 = vsel %vm1029_vm1, %v1046_v55, %v1045_v48  ;;  %v3214_v62 = vld [vmem:[#allocation11 + $0x114] sm:$0xf0]  ;;  %v3766_v2 = vld [vmem:[#allocation11 + $0x1e4] sm:$0xf]  ;;  %v3137_v4 = vor.u32 %v3720_v57, %v3136_v54 }
 0x15d   : > { %1726 = vmatpush.bf16.msra.mxu1 %v3177_v26  ;;  %v4778_v0 = vadd.f32 %v1047_v60, %v1038_v51  ;;  %v3322_v3 = vld [vmem:[#allocation11 + $0x1ec] sm:$0xf0]  ;;  %v3233_v5 = vor.u32 %v3744_v59, %v3232_v58  ;;  %v3217_v6 = vor.u32 %v3739_v61, %v3214_v62  ;;  %v3202_v9 = vld [vmem:[#allocation11 + $0xfc] sm:$0xf0]  ;;  %v3733_v12 = vld [vmem:[#allocation11 + $0xdc] sm:$0xf] }
 0x15e   : > { %1758 = vmatpush.bf16.msrb.mxu0 %v3265_v8  ;;  %v3990_v1 = vpop.eup %3989  ;;  %v3736_v8 = vld [vmem:[#allocation11 + $0xf4] sm:$0xf]  ;;  %v3325_v10 = vor.u32 %v3766_v2, %v3322_v3  ;;  %v3190_v13 = vld [vmem:[#allocation11 + $0xe4] sm:$0xf0] }
 0x15f   : > { %1053 = vst [vmem:[#allocation1] ss:$4 sm:$0xff] %v4778_v0  ;;  %v1082_v7 = vmul.f32 2.0, %v3990_v1  ;;  %v3205_v11 = vor.u32 %v3736_v8, %v3202_v9  ;;  %v1091_v15 = vmul.f32 %v4778_v0, %v4778_v0  ;;  %v3193_v18 = vor.u32 %v3733_v12, %v3190_v13 }
 0x160   : > { %1784 = vmatpush.bf16.msrb.mxu2 %v3173_v20  ;;  %1797 = vmatpush.bf16.msrb.mxu3 %v3269_v21  ;;  %vm1086_vm2 = vweird.f32 %v3990_v1 }
 0x161   : > { %1771 = vmatpush.bf16.msrb.mxu1 %v3361_v29  ;;  %v1083_v14 = vsub.f32 1.0, %v1082_v7 }
 0x162   : > { %1759 = vmatpush.bf16.msrb.mxu0 %v3253_v25 }
 0x163   : > { %v1084_v25 = vmul.f32 %v3990_v1, %v1083_v14 }
 0x164   : > { %1785 = vmatpush.bf16.msrb.mxu2 %v3161_v30  ;;  %1798 = vmatpush.bf16.msrb.mxu3 %v3257_v31 }
 0x165   : > { %1772 = vmatpush.bf16.msrb.mxu1 %v3349_v46  ;;  %v1085_v32 = vadd.f32 %v3990_v1, %v1084_v25 }
 0x166   : > { %1760 = vmatpush.bf16.msrb.mxu0 %v3241_v39  ;;  %v1054_v16 = vld.sshfl [vmem:[#allocation1] sm:$0xff pattern:$0x73625140]  ;;  %v1055_v17 = vld.sshfl [vmem:[#allocation1 + $0x8] sm:$0xff pattern:$0x73625140] }
 0x167   : > { %v1056_v19 = vld.sshfl [vmem:[#allocation1 + $0x10] sm:$0xff pattern:$0x73625140]  ;;  %v1060_v20 = vsel %vm1027_vm0, %v1054_v16, 0.0  ;;  %v1067_v21 = vsel %vm1027_vm0, %v1055_v17, 0.0  ;;  %v4786_v41 = vsel %vm1086_vm2, %v3990_v1, %v1085_v32 }
 0x168   : > { %1786 = vmatpush.bf16.msrb.mxu2 %v3149_v52  ;;  %1799 = vmatpush.bf16.msrb.mxu3 %v3245_v53  ;;  %v1061_v22 = vrot.slane %v1060_v20, 4  ;;  %v1068_v23 = vrot.slane %v1067_v21, 4  ;;  %v1074_v24 = vsel %vm1027_vm0, %v1056_v19, 0.0  ;;  %1093 = vst [vmem:[#allocation1] ss:$4 sm:$0xff] %v1091_v15 }
 0x169   : > { %1773 = vmatpush.bf16.msrb.mxu1 %v3337_v63  ;;  %v1075_v26 = vrot.slane %v1074_v24, 4  ;;  %v3730_v16 = vld [vmem:[#allocation11 + $0xc4] sm:$0xf]  ;;  %v3178_v17 = vld [vmem:[#allocation11 + $0xcc] sm:$0xf0] }
 0x16a   : > { %1761 = vmatpush.bf16.msrb.mxu0 %v3229_v56  ;;  %v1062_v27 = vadd.f32 %v1061_v22, %v1060_v20  ;;  %v1069_v28 = vadd.f32 %v1068_v23, %v1067_v21  ;;  %v3181_v21 = vor.u32 %v3730_v16, %v3178_v17  ;;  %v3124_v22 = vld [vmem:[#allocation11 + $0x50] sm:$0xf] }
 0x16b   : > { %v1076_v29 = vadd.f32 %v1075_v26, %v1074_v24  ;;  %v3220_v23 = vld [vmem:[#allocation11 + $0x110] sm:$0xf]  ;;  %v3741_v26 = vld [vmem:[#allocation11 + $0x118] sm:$0xf0] }
 0x16c   : > { %1787 = vmatpush.bf16.msrb.mxu2 %v3137_v4  ;;  %1800 = vmatpush.bf16.msrb.mxu3 %v3233_v5  ;;  %v1063_v30 = vrot.slane %v1062_v27, 2  ;;  %v1070_v31 = vrot.slane %v1069_v28, 2 }
 0x16d   : > { %1774 = vmatpush.bf16.msrb.mxu1 %v3325_v10  ;;  %v1077_v33 = vrot.slane %v1076_v29, 2 }
 0x16e   : > { %1762 = vmatpush.bf16.msrb.mxu0 %v3217_v6  ;;  %v1064_v34 = vadd.f32 %v1063_v30, %v1062_v27  ;;  %v1071_v35 = vadd.f32 %v1070_v31, %v1069_v28  ;;  %v3763_v30 = vld [vmem:[#allocation11 + $0x1cc] sm:$0xf]  ;;  %v3310_v31 = vld [vmem:[#allocation11 + $0x1d4] sm:$0xf0] }
 0x16f   : > { %v1078_v36 = vadd.f32 %v1077_v33, %v1076_v29  ;;  %v1094_v37 = vld.sshfl [vmem:[#allocation1] sm:$0xff pattern:$0x73625140]  ;;  %v1095_v38 = vld.sshfl [vmem:[#allocation1 + $0x8] sm:$0xff pattern:$0x73625140]  ;;  %v3221_v29 = vor.u32 %v3741_v26, %v3220_v23 }
 0x170   : > { %v1065_v39 = vrot.slane %v1064_v34, 1  ;;  %v1072_v40 = vrot.slane %v1071_v35, 1  ;;  %v1096_v42 = vld.sshfl [vmem:[#allocation1 + $0x10] sm:$0xff pattern:$0x73625140]  ;;  %v1100_v43 = vsel %vm1027_vm0, %v1094_v37, 0.0 }
 0x171   : > { %v1079_v44 = vrot.slane %v1078_v36, 1  ;;  %v1101_v45 = vrot.slane %v1100_v43, 4  ;;  %v1114_v46 = vsel %vm1027_vm0, %v1096_v42, 0.0  ;;  %v1107_v47 = vsel %vm1027_vm0, %v1095_v38, 0.0  ;;  %1801 = vmatpush.bf16.msrb.mxu3 %v3221_v29  ;;  %v3112_v38 = vld [vmem:[#allocation11 + $0x38] sm:$0xf] }
 0x172   : > { %1763 = vmatpush.bf16.msrb.mxu0 %v3205_v11  ;;  %v1066_v48 = vadd.f32 %v1065_v39, %v1064_v34  ;;  %v1073_v49 = vadd.f32 %v1072_v40, %v1071_v35  ;;  %v1115_v50 = vrot.slane %v1114_v46, 4  ;;  %v1108_v51 = vrot.slane %v1107_v47, 4  ;;  %v3714_v40 = vld [vmem:[#allocation11 + $0x40] sm:$0xf0]  ;;  %v3208_v42 = vld [vmem:[#allocation11 + $0xf8] sm:$0xf] }
 0x173   : > { %v1080_v52 = vadd.f32 %v1079_v44, %v1078_v36  ;;  %v1102_v53 = vadd.f32 %v1101_v45, %v1100_v43  ;;  %v3313_v34 = vor.u32 %v3763_v30, %v3310_v31  ;;  %v3113_v43 = vor.u32 %v3714_v40, %v3112_v38  ;;  %v3738_v44 = vld [vmem:[#allocation11 + $0x100] sm:$0xf0] }
 0x174   : > { %v1089_v54 = vmul.f32 %v4786_v41, %v1073_v49  ;;  %v1116_v55 = vadd.f32 %v1115_v50, %v1114_v46  ;;  %v1109_v58 = vadd.f32 %v1108_v51, %v1107_v47  ;;  %v1088_v59 = vmul.f32 %v4786_v41, %v1066_v48  ;;  %v3760_v46 = vld [vmem:[#allocation11 + $0x1b4] sm:$0xf]  ;;  %v3298_v47 = vld [vmem:[#allocation11 + $0x1bc] sm:$0xf0]  ;;  %v3711_v50 = vld [vmem:[#allocation11 + $0x28] sm:$0xf0] }
 0x175   : > { %v1090_v56 = vmul.f32 %v4786_v41, %v1080_v52  ;;  %v1103_v57 = vrot.slane %v1102_v53, 2  ;;  %1775 = vmatpush.bf16.msrb.mxu1 %v3313_v34  ;;  %v3209_v45 = vor.u32 %v3738_v44, %v3208_v42  ;;  %v3100_v48 = vld [vmem:[#allocation11 + $0x20] sm:$0xf]  ;;  %v3301_v49 = vor.u32 %v3760_v46, %v3298_v47  ;;  %v3735_v52 = vld [vmem:[#allocation11 + $0xe8] sm:$0xf0] }
 0x176   : > { %1764 = vmatpush.bf16.msrb.mxu0 %v3193_v18  ;;  %v1136_v60 = vrot.slane %v1089_v54, 6  ;;  %v1117_v61 = vrot.slane %v1116_v55, 2  ;;  %v1110_v3 = vrot.slane %v1109_v58, 2  ;;  %v1124_v10 = vmul.f32 %v1088_v59, %v1088_v59  ;;  %v3196_v51 = vld [vmem:[#allocation11 + $0xe0] sm:$0xf] }
 0x177   : > { %v1104_v62 = vadd.f32 %v1103_v57, %v1102_v53  ;;  %v1137_v63 = vrot.slane %v1090_v56, 4  ;;  %v1126_v12 = vmul.f32 %v1090_v56, %v1090_v56  ;;  %v1125_v19 = vmul.f32 %v1089_v54, %v1089_v54  ;;  %v1050_v53 = vld [vmem:[#allocation9] sm:$0x7]  ;;  %1802 = vmatpush.bf16.msrb.mxu3 %v3209_v45  ;;  %v3364_v45 = vld [vmem:[#allocation11 + $0x230] sm:$0xf] }
 0x178   : > { %v1138_v1 = vsel %vm1027_vm0, %v1088_v59, %v1136_v60  ;;  %v1118_v2 = vadd.f32 %v1117_v61, %v1116_v55  ;;  %v1111_v8 = vadd.f32 %v1110_v3, %v1109_v58  ;;  %v3101_v54 = vor.u32 %v3711_v50, %v3100_v48  ;;  %v3757_v56 = vld [vmem:[#allocation11 + $0x19c] sm:$0xf]  ;;  %v3286_v58 = vld [vmem:[#allocation11 + $0x1a4] sm:$0xf0]  ;;  %v3708_v60 = vld [vmem:[#allocation11 + $0x10] sm:$0xf0] }
 0x179   : > { %v1105_v4 = vrot.slane %v1104_v62, 1  ;;  %v1139_v5 = vsel %vm1029_vm1, %v1138_v1, %v1137_v63  ;;  %v3197_v55 = vor.u32 %v3735_v52, %v3196_v51  ;;  %1776 = vmatpush.bf16.msrb.mxu1 %v3301_v49  ;;  %v3088_v59 = vld [vmem:[#allocation11 + $0x8] sm:$0xf]  ;;  %v3289_v63 = vor.u32 %v3757_v56, %v3286_v58  ;;  %v3352_v52 = vld [vmem:[#allocation11 + $0x218] sm:$0xf] }
 0x17a   : > { %v1141_v6 = vsub.f32 %v4778_v0, %v1139_v5  ;;  %v1119_v7 = vrot.slane %v1118_v2, 1  ;;  %v1112_v13 = vrot.slane %v1111_v8, 1  ;;  %v3717_v0 = vld [vmem:[#allocation11 + $0x58] sm:$0xf0]  ;;  %1765 = vmatpush.bf16.msrb.mxu0 %v3181_v21  ;;  %v3184_v1 = vld [vmem:[#allocation11 + $0xc8] sm:$0xf] }
 0x17b   : > { %v1106_v9 = vadd.f32 %v1105_v4, %v1104_v62  ;;  %v3125_v25 = vor.u32 %v3717_v0, %v3124_v22  ;;  %v3089_v4 = vor.u32 %v3708_v60, %v3088_v59  ;;  %v3754_v5 = vld [vmem:[#allocation11 + $0x184] sm:$0xf]  ;;  %1803 = vmatpush.bf16.msrb.mxu3 %v3197_v55  ;;  %v1145_v16 = vperm.slane %v1050_v53, 2 }
 0x17c   : > { %1150 = vst [vmem:[#allocation1] ss:$4 sm:$0xff] %v1141_v6  ;;  %v1120_v11 = vadd.f32 %v1119_v7, %v1118_v2  ;;  %v1113_v18 = vadd.f32 %v1112_v13, %v1111_v8  ;;  %v3732_v2 = vld [vmem:[#allocation11 + $0xd0] sm:$0xf0]  ;;  %v1143_v7 = vperm.slane %v1050_v53, 0  ;;  %v1144_v0 = vperm.slane %v1050_v53, 1 }
 0x17d   : > { %v1121_v14 = vmul.f32 %v1106_v9, %v4786_v41  ;;  %1788 = vmatpush.bf16.msrb.mxu2 %v3125_v25  ;;  %v3185_v9 = vor.u32 %v3732_v2, %v3184_v1  ;;  %1777 = vmatpush.bf16.msrb.mxu1 %v3289_v63  ;;  %v3774_v56 = vld [vmem:[#allocation11 + $0x220] sm:$0xf0]  ;;  %v3328_v1 = vld [vmem:[#allocation11 + $0x1e8] sm:$0xf]  ;;  %v3768_v2 = vld [vmem:[#allocation11 + $0x1f0] sm:$0xf0] }
 0x17e   : > { %v1123_v15 = vmul.f32 %v1120_v11, %v4786_v41  ;;  %v1122_v27 = vmul.f32 %v1113_v18, %v4786_v41  ;;  %v3353_v60 = vor.u32 %v3774_v56, %v3352_v52 }
 0x17f   : > { %v1127_v20 = vsub.f32 %v1121_v14, %v1124_v10  ;;  %v3274_v10 = vld [vmem:[#allocation11 + $0x18c] sm:$0xf0]  ;;  %1804 = vmatpush.bf16.msrb.mxu3 %v3185_v9 }
 0x180   : > { %v1129_v24 = vsub.f32 %v1123_v15, %v1126_v12  ;;  %v1128_v33 = vsub.f32 %v1122_v27, %v1125_v19  ;;  %v3277_v14 = vor.u32 %v3754_v5, %v3274_v10  ;;  %v3765_v5 = vld [vmem:[#allocation11 + $0x1d8] sm:$0xf0]  ;;  %v3292_v10 = vld [vmem:[#allocation11 + $0x1a0] sm:$0xf] }
 0x181   : > { %v1130_v28 = vmax.f32 %v1127_v20, 0.0  ;;  %1789 = vmatpush.bf16.msrb.mxu2 %v3113_v43  ;;  %v1051_v20 = vld [vmem:[%s4980_s4] sm:$0x7] }
 0x182   : > { %v1132_v32 = vmax.f32 %v1129_v24, 0.0  ;;  %v1131_v37 = vmax.f32 %v1128_v33, 0.0  ;;  %1778 = vmatpush.bf16.msrb.mxu1 %v3277_v14  ;;  %v1197_v29 = vperm.slane %v1051_v20, 0  ;;  %v1199_v33 = vperm.slane %v1051_v20, 2  ;;  %v3756_v14 = vld [vmem:[#allocation11 + $0x190] sm:$0xf0] }
 0x183   : > { %v4800_v35 = vadd.f32 1e-05, %v1130_v28  ;;  %v1151_v11 = vld.sshfl [vmem:[#allocation1] sm:$0xff pattern:$0x73625140]  ;;  %v1198_v40 = vperm.slane %v1051_v20, 1 }
 0x184   : > { %v4802_v36 = vadd.f32 1e-05, %v1132_v32  ;;  %v4806_v39 = vadd.f32 1e-05, %v1131_v37  ;;  %v1157_v21 = vmul.f32 %v1151_v11, %v1143_v7  ;;  %v3304_v7 = vld [vmem:[#allocation11 + $0x1b8] sm:$0xf] }
 0x185   : > { %3991 = vrsqrt.f32 %v4800_v35  ;;  %1790 = vmatpush.bf16.msrb.mxu2 %v3101_v54  ;;  %vm1169_vm3 = vweird.f32 %v4800_v35  ;;  %v1153_v17 = vld.sshfl [vmem:[#allocation1 + $0x10] sm:$0xff pattern:$0x73625140]  ;;  %v1152_v25 = vld.sshfl [vmem:[#allocation1 + $0x8] sm:$0xff pattern:$0x73625140] }
 0x186   : > { %3993 = vrsqrt.f32 %v4802_v36  ;;  %vm1189_vm5 = vweird.f32 %v4802_v36  ;;  %vm1179_vm8 = vweird.f32 %v4806_v39  ;;  %v1159_v28 = vmul.f32 %v1153_v17, %v1145_v16  ;;  %v3759_v11 = vld [vmem:[#allocation11 + $0x1a8] sm:$0xf0]  ;;  %v3452_v16 = vld [vmem:[#allocation15 + $0xa8] sm:$0xf]  ;;  %v3800_v17 = vld [vmem:[#allocation15 + $0xb0] sm:$0xf0] }
 0x187   : > { %3995 = vrsqrt.f32 %v4806_v39  ;;  %v1158_v34 = vmul.f32 %v1152_v25, %v1144_v0  ;;  %v3797_v20 = vld [vmem:[#allocation15 + $0x98] sm:$0xf0]  ;;  %v3794_v0 = vld [vmem:[#allocation15 + $0x80] sm:$0xf0]  ;;  %v3791_v25 = vld [vmem:[#allocation15 + $0x68] sm:$0xf0] }
 0x189   : > { %1791 = vmatpush.bf16.msrb.mxu2 %v3089_v4  ;;  %v3316_v4 = vld [vmem:[#allocation11 + $0x1d0] sm:$0xf] }
 0x18b   : > { %v3992_v57 = vpop.eup %3991 }
 0x18c   : > { %v3994_v61 = vpop.eup %3993  ;;  %v1164_v62 = vmul.f32 %v3992_v57, %v4800_v35  ;;  %vm1170_vm4 = vweird.f32 %v3992_v57 }
 0x18d   : > { %v1184_v3 = vmul.f32 %v3994_v61, %v4802_v36  ;;  %v3996_v6 = vpop.eup %3995  ;;  %vm1190_vm6 = vweird.f32 %v3994_v61  ;;  %vm4817_vm7 = vmor %vm1169_vm3, %vm1170_vm4  ;;  %v3777_v36 = vld [vmem:[#allocation11 + $0x238] sm:$0xf0] }
 0x18e   : > { %v1165_v8 = vmul.f32 %v3992_v57, %v1164_v62  ;;  %v1174_v13 = vmul.f32 %v3996_v6, %v4806_v39  ;;  %vm1180_vm9 = vweird.f32 %v3996_v6  ;;  %vm1191_vm10 = vmor %vm1189_vm5, %vm1190_vm6  ;;  %v3365_v51 = vor.u32 %v3777_v36, %v3364_v45  ;;  %v3771_v62 = vld [vmem:[#allocation11 + $0x208] sm:$0xf0]  ;;  %v3380_v45 = vld [vmem:[#allocation15 + $0x18] sm:$0xf] }
 0x18f   : > { %v1185_v12 = vmul.f32 %v3994_v61, %v1184_v3  ;;  %vm1181_vm11 = vmor %vm1179_vm8, %vm1180_vm9  ;;  %v3329_v3 = vor.u32 %v3768_v2, %v3328_v1  ;;  %v3782_v36 = vld [vmem:[#allocation15 + $0x20] sm:$0xf0] }
 0x190   : > { %v1166_v15 = vmul.f32 0.5, %v1165_v8  ;;  %v1175_v19 = vmul.f32 %v3996_v6, %v1174_v13  ;;  %v3762_v8 = vld [vmem:[#allocation11 + $0x1c0] sm:$0xf0]  ;;  %v3280_v13 = vld [vmem:[#allocation11 + $0x188] sm:$0xf] }
 0x191   : > { %v1186_v18 = vmul.f32 0.5, %v1185_v12  ;;  %v3305_v9 = vor.u32 %v3762_v8, %v3304_v7  ;;  %v3293_v12 = vor.u32 %v3759_v11, %v3292_v10  ;;  %v3784_v7 = vld [vmem:[#allocation15 + $0x34] sm:$0xf]  ;;  %v3394_v10 = vld [vmem:[#allocation15 + $0x3c] sm:$0xf0] }
 0x192   : > { %v1167_v22 = vsub.f32 1.5, %v1166_v15  ;;  %v1176_v26 = vmul.f32 0.5, %v1175_v19  ;;  %v3281_v15 = vor.u32 %v3756_v14, %v3280_v13  ;;  %v3440_v19 = vld [vmem:[#allocation15 + $0x90] sm:$0xf]  ;;  %v3820_v11 = vld [vmem:[#allocation15 + $0x154] sm:$0xf]  ;;  %v3397_v13 = vor.u32 %v3784_v7, %v3394_v10 }
 0x193   : > { %v1187_v24 = vsub.f32 1.5, %v1186_v18  ;;  %v3453_v18 = vor.u32 %v3800_v17, %v3452_v16  ;;  %v3512_v17 = vld [vmem:[#allocation15 + $0x120] sm:$0xf]  ;;  %v3620_v10 = vld [vmem:[#allocation15 + $0x1f8] sm:$0xf] }
 0x194   : > { %v1168_v27 = vmul.f32 %v3992_v57, %v1167_v22  ;;  %v1177_v31 = vsub.f32 1.5, %v1176_v26  ;;  %v3428_v22 = vld [vmem:[#allocation15 + $0x78] sm:$0xf] }
 0x195   : > { %v1188_v30 = vmul.f32 %v3994_v61, %v1187_v24  ;;  %v3429_v23 = vor.u32 %v3794_v0, %v3428_v22  ;;  %v3416_v24 = vld [vmem:[#allocation15 + $0x60] sm:$0xf]  ;;  %v3382_v22 = vld [vmem:[#allocation15 + $0x24] sm:$0xf0]  ;;  %v3817_v0 = vld [vmem:[#allocation15 + $0x13c] sm:$0xf] }
 0x196   : > { %v1172_v32 = vsel %vm4817_vm7, %v3992_v57, %v1168_v27  ;;  %v1178_v38 = vmul.f32 %v3996_v6, %v1177_v31  ;;  %v3417_v26 = vor.u32 %v3791_v25, %v3416_v24  ;;  %v3799_v27 = vld [vmem:[#allocation15 + $0xac] sm:$0xf]  ;;  %v3788_v31 = vld [vmem:[#allocation15 + $0x50] sm:$0xf0] }
 0x197   : > { %v1193_v35 = vmul.f32 %v1172_v32, %v1157_v21  ;;  %v1192_v37 = vsel %vm1191_vm10, %v3994_v61, %v1188_v30  ;;  %v3340_v61 = vld [vmem:[#allocation11 + $0x200] sm:$0xf]  ;;  %v3441_v21 = vor.u32 %v3797_v20, %v3440_v19  ;;  %v3404_v30 = vld [vmem:[#allocation15 + $0x48] sm:$0xf] }
 0x198   : > { %v1195_v39 = vmul.f32 %v1192_v37, %v1159_v28  ;;  %v1182_v43 = vsel %vm1181_vm11, %v3996_v6, %v1178_v38  ;;  %v3341_v63 = vor.u32 %v3771_v62, %v3340_v61  ;;  %v3317_v6 = vor.u32 %v3765_v5, %v3316_v4  ;;  %v3454_v28 = vld [vmem:[#allocation15 + $0xb4] sm:$0xf0]  ;;  %v3392_v37 = vld [vmem:[#allocation15 + $0x30] sm:$0xf]  ;;  %v3785_v38 = vld [vmem:[#allocation15 + $0x38] sm:$0xf0] }
 0x199   : > { %v1203_v42 = vadd.f32 %v1197_v29, %v1193_v35  ;;  %v1194_v46 = vmul.f32 %v1182_v43, %v1158_v34  ;;  %v3457_v29 = vor.u32 %v3799_v27, %v3454_v28  ;;  %v3405_v32 = vor.u32 %v3788_v31, %v3404_v30  ;;  %v3442_v34 = vld [vmem:[#allocation15 + $0x9c] sm:$0xf0]  ;;  %v3406_v61 = vld [vmem:[#allocation15 + $0x54] sm:$0xf0]  ;;  %v3823_v62 = vld [vmem:[#allocation15 + $0x16c] sm:$0xf] }
 0x19a   : > { %v1205_v44 = vadd.f32 %v1199_v33, %v1195_v39  ;;  %v3796_v33 = vld [vmem:[#allocation15 + $0x94] sm:$0xf]  ;;  %v3393_v39 = vor.u32 %v3785_v38, %v3392_v37  ;;  %v3524_v5 = vld [vmem:[#allocation15 + $0x138] sm:$0xf]  ;;  %v3644_v27 = vld [vmem:[#allocation15 + $0x228] sm:$0xf] }
 0x19b   : > { %vm1206_vm12 = vcmp.ge.f32.partialorder %v1203_v42, 0.0  ;;  %v1209_v47 = vmul.f32 0.1, %v1203_v42  ;;  %v1204_v49 = vadd.f32 %v1198_v40, %v1194_v46  ;;  %v3445_v35 = vor.u32 %v3796_v33, %v3442_v34  ;;  %v3793_v40 = vld [vmem:[#allocation15 + $0x7c] sm:$0xf] }
 0x19c   : > { %vm1208_vm13 = vcmp.ge.f32.partialorder %v1205_v44, 0.0  ;;  %v1211_v48 = vmul.f32 0.1, %v1205_v44  ;;  %v3381_v46 = vor.u32 %v3782_v36, %v3380_v45  ;;  %v3848_v28 = vld [vmem:[#allocation15 + $0x230] sm:$0xf0] }
 0x19d   : > { %v1212_v50 = vsel %vm1206_vm12, %v1203_v42, %v1209_v47  ;;  %vm1207_vm14 = vcmp.ge.f32.partialorder %v1204_v49, 0.0  ;;  %v1210_v55 = vmul.f32 0.1, %v1204_v49  ;;  %v3430_v42 = vld [vmem:[#allocation15 + $0x84] sm:$0xf0]  ;;  %v3645_v31 = vor.u32 %v3848_v28, %v3644_v27 }
 0x19e   : > { %v1215_v53 = vpack.c.bf16 %v1212_v50, %v1212_v50  ;;  %v1214_v54 = vsel %vm1208_vm13, %v1205_v44, %v1211_v48  ;;  %v3433_v43 = vor.u32 %v3793_v40, %v3430_v42  ;;  %v4827_v44 = vld [vmem:[#allocation12] sm:$0x7]  ;;  %v3548_v47 = vld [vmem:[#allocation15 + $0x168] sm:$0xf]  ;;  %v3824_v48 = vld [vmem:[#allocation15 + $0x170] sm:$0xf0] }
 0x19f   : > { %v1217_v57 = vpack.c.bf16 %v1214_v54, %v1214_v54  ;;  %v1213_v58 = vsel %vm1207_vm14, %v1204_v49, %v1210_v55  ;;  %v3790_v49 = vld [vmem:[#allocation15 + $0x64] sm:$0xf]  ;;  %v3549_v50 = vor.u32 %v3824_v48, %v3548_v47  ;;  %v3368_v54 = vld [vmem:[#allocation15] sm:$0xf]  ;;  %v3779_v55 = vld [vmem:[#allocation15 + $0x8] sm:$0xf0] }
 0x1a0   : > { %1714 = vmatmul.bf16.vlgmr.msra.gmra.mxu0 %v1215_v53  ;;  %1753 = vmatmul.bf16.vlgmr.msra.gmra.mxu3 %v1215_v53  ;;  %v1216_v59 = vpack.c.bf16 %v1213_v58, %v1213_v58  ;;  %v3369_v56 = vor.u32 %v3779_v55, %v3368_v54  ;;  %v3821_v58 = vld [vmem:[#allocation15 + $0x158] sm:$0xf0]  ;;  %v3500_v34 = vld [vmem:[#allocation15 + $0x108] sm:$0xf]  ;;  %v3778_v40 = vld [vmem:[#allocation15 + $0x4] sm:$0xf] }
 0x1a1   : > { %1740 = vmatmul.bf16.vlgmr.msra.gmra.mxu2 %v1217_v57  ;;  %1810 = vmatpush.bf16.msra.mxu0 %v3365_v51  ;;  %v3418_v51 = vld [vmem:[#allocation15 + $0x6c] sm:$0xf0]  ;;  %v3814_v36 = vld [vmem:[#allocation15 + $0x124] sm:$0xf]  ;;  %v3608_v27 = vld [vmem:[#allocation15 + $0x1e0] sm:$0xf] }
 0x1a2   : > { %1727 = vmatmul.bf16.vlgmr.msra.gmra.mxu1 %v1216_v59  ;;  %v3421_v52 = vor.u32 %v3790_v49, %v3418_v51  ;;  %2457 = vmatpush.bf16.msra.mxu2 %v3549_v50  ;;  %v3370_v42 = vld [vmem:[#allocation15 + $0xc] sm:$0xf0] }
 0x1a3   : > { %2444 = vmatpush.bf16.msra.mxu1 %v3453_v18  ;;  %v3815_v18 = vld [vmem:[#allocation15 + $0x128] sm:$0xf0]  ;;  %2470 = vmatpush.bf16.msra.mxu3 %v3645_v31  ;;  %v3373_v45 = vor.u32 %v3778_v40, %v3370_v42  ;;  %v3556_v51 = vld [vmem:[#allocation15 + $0x170] sm:$0xf] }
 0x1a4   : > { %v3513_v20 = vor.u32 %v3815_v18, %v3512_v17  ;;  %v3632_v55 = vld [vmem:[#allocation15 + $0x210] sm:$0xf]  ;;  %v3839_v31 = vld [vmem:[#allocation15 + $0x1e8] sm:$0xf0] }
 0x1a5   : > { %1811 = vmatpush.bf16.msra.mxu0 %v3353_v60 }
 0x1a7   : > { %2445 = vmatpush.bf16.msra.mxu1 %v3441_v21  ;;  %v3781_v21 = vld [vmem:[#allocation15 + $0x1c] sm:$0xf] }
 0x1a8   : > { %v3385_v25 = vor.u32 %v3781_v21, %v3382_v22  ;;  %v3490_v21 = vld [vmem:[#allocation15 + $0xfc] sm:$0xf0] }
 0x1a9   : > { %1812 = vmatpush.bf16.msra.mxu0 %v3341_v63  ;;  %v3550_v63 = vld [vmem:[#allocation15 + $0x174] sm:$0xf0]  ;;  %v3532_v22 = vld [vmem:[#allocation15 + $0x140] sm:$0xf] }
 0x1ab   : > { %2446 = vmatpush.bf16.msra.mxu1 %v3429_v23 }
 0x1ad   : > { %1813 = vmatpush.bf16.msra.mxu0 %v3329_v3  ;;  %v3553_v3 = vor.u32 %v3823_v62, %v3550_v63  ;;  %v3809_v62 = vld [vmem:[#allocation15 + $0xf8] sm:$0xf0]  ;;  %v3811_v63 = vld [vmem:[#allocation15 + $0x10c] sm:$0xf] }
 0x1af   : > { %2447 = vmatpush.bf16.msra.mxu1 %v3417_v26  ;;  %v3526_v26 = vld [vmem:[#allocation15 + $0x144] sm:$0xf0] }
 0x1b0   : > { %1766 = vmatmul.bf16.vlgmr.msrb.gmra.mxu0 %v1216_v59  ;;  %1805 = vmatmul.bf16.vlgmr.msrb.gmra.mxu3 %v1216_v59  ;;  %v3787_v59 = vld [vmem:[#allocation15 + $0x4c] sm:$0xf]  ;;  %v3529_v30 = vor.u32 %v3817_v0, %v3526_v26 }
 0x1b1   : > { %1792 = vmatmul.bf16.vlgmr.msrb.gmra.mxu2 %v1215_v53  ;;  %1814 = vmatpush.bf16.msra.mxu0 %v3317_v6  ;;  %v1316_v53 = vperm.slane %v4827_v44, 0  ;;  %v3409_v2 = vor.u32 %v3787_v59, %v3406_v61  ;;  %v3818_v6 = vld [vmem:[#allocation15 + $0x140] sm:$0xf0]  ;;  %v3819_v26 = vld [vmem:[#allocation15 + $0x148] sm:$0xf0] }
 0x1b2   : > { %1779 = vmatmul.bf16.vlgmr.msrb.gmra.mxu1 %v1217_v57 }
 0x1b3   : > { %2448 = vmatpush.bf16.msra.mxu1 %v3405_v32 }
 0x1b5   : > { %1815 = vmatpush.bf16.msra.mxu0 %v3305_v9  ;;  %v3525_v9 = vor.u32 %v3818_v6, %v3524_v5  ;;  %v3822_v5 = vld [vmem:[#allocation15 + $0x160] sm:$0xf0] }
 0x1b7   : > { %2449 = vmatpush.bf16.msra.mxu1 %v3393_v39 }
 0x1b9   : > { %1816 = vmatpush.bf16.msra.mxu0 %v3293_v12  ;;  %v3538_v12 = vld [vmem:[#allocation15 + $0x15c] sm:$0xf0] }
 0x1ba   : > { %v3541_v14 = vor.u32 %v3820_v11, %v3538_v12  ;;  %v3842_v11 = vld [vmem:[#allocation15 + $0x200] sm:$0xf0] }
 0x1bb   : > { %2450 = vmatpush.bf16.msra.mxu1 %v3381_v46  ;;  %v3514_v46 = vld [vmem:[#allocation15 + $0x12c] sm:$0xf0] }
 0x1bc   : > { %v3517_v50 = vor.u32 %v3814_v36, %v3514_v46  ;;  %v3478_v36 = vld [vmem:[#allocation15 + $0xe4] sm:$0xf0] }
 0x1bd   : > { %1817 = vmatpush.bf16.msra.mxu0 %v3281_v15 }
 0x1bf   : > { %2451 = vmatpush.bf16.msra.mxu1 %v3369_v56  ;;  %v3845_v56 = vld [vmem:[#allocation15 + $0x218] sm:$0xf0] }
 0x1c0   : > { %1818 = vmatmul.bf16.vlgmr.msra.gmra.mxu0 %v1217_v57  ;;  %v3536_v57 = vld [vmem:[#allocation15 + $0x150] sm:$0xf]  ;;  %v3633_v61 = vor.u32 %v3845_v56, %v3632_v55  ;;  %v3520_v55 = vld [vmem:[#allocation15 + $0x128] sm:$0xf]  ;;  %v3816_v56 = vld [vmem:[#allocation15 + $0x130] sm:$0xf0] }
 0x1c1   : > { %2483 = vmatpush.bf16.msrb.mxu0 %v3457_v29  ;;  %v3537_v60 = vor.u32 %v3821_v58, %v3536_v57  ;;  %v1317_v29 = vperm.slane %v4827_v44, 1  ;;  %v3488_v57 = vld [vmem:[#allocation15 + $0xf0] sm:$0xf] }
 0x1c2   : > { %2471 = vmatpush.bf16.msra.mxu3 %v3633_v61  ;;  %v3836_v61 = vld [vmem:[#allocation15 + $0x1d0] sm:$0xf0] }
 0x1c3   : > { %2458 = vmatpush.bf16.msra.mxu2 %v3537_v60  ;;  %2496 = vmatpush.bf16.msrb.mxu1 %v3553_v3  ;;  %v3502_v3 = vld [vmem:[#allocation15 + $0x114] sm:$0xf0] }
 0x1c5   : > { %2484 = vmatpush.bf16.msrb.mxu0 %v3445_v35  ;;  %v3812_v35 = vld [vmem:[#allocation15 + $0x110] sm:$0xf0] }
 0x1c6   : > { %v3501_v39 = vor.u32 %v3812_v35, %v3500_v34  ;;  %v3609_v35 = vor.u32 %v3839_v31, %v3608_v27 }
 0x1c7   : > { %2459 = vmatpush.bf16.msra.mxu2 %v3525_v9  ;;  %2497 = vmatpush.bf16.msrb.mxu1 %v3541_v14  ;;  %v3505_v9 = vor.u32 %v3811_v63, %v3502_v3  ;;  %v3476_v14 = vld [vmem:[#allocation15 + $0xd8] sm:$0xf] }
 0x1c9   : > { %2485 = vmatpush.bf16.msrb.mxu0 %v3433_v43 }
 0x1cb   : > { %2460 = vmatpush.bf16.msra.mxu2 %v3513_v20  ;;  %2498 = vmatpush.bf16.msrb.mxu1 %v3529_v30  ;;  %v3533_v30 = vor.u32 %v3819_v26, %v3532_v22 }
 0x1cd   : > { %2486 = vmatpush.bf16.msrb.mxu0 %v3421_v52  ;;  %v3825_v52 = vld [vmem:[#allocation15 + $0x178] sm:$0xf0] }
 0x1ce   : > { %v3557_v54 = vor.u32 %v3825_v52, %v3556_v51  ;;  %v3646_v51 = vld [vmem:[#allocation15 + $0x234] sm:$0xf0] }
 0x1cf   : > { %2461 = vmatpush.bf16.msra.mxu2 %v3501_v39  ;;  %2499 = vmatpush.bf16.msrb.mxu1 %v3517_v50  ;;  %v3847_v50 = vld [vmem:[#allocation15 + $0x22c] sm:$0xf] }
 0x1d1   : > { %2487 = vmatpush.bf16.msrb.mxu0 %v3409_v2  ;;  %v3489_v2 = vor.u32 %v3809_v62, %v3488_v57  ;;  %v3596_v57 = vld [vmem:[#allocation15 + $0x1c8] sm:$0xf]  ;;  %v3802_v62 = vld [vmem:[#allocation15 + $0xc4] sm:$0xf] }
 0x1d2   : > { %v3597_v3 = vor.u32 %v3836_v61, %v3596_v57 }
 0x1d3   : > { %2462 = vmatpush.bf16.msra.mxu2 %v3489_v2  ;;  %2500 = vmatpush.bf16.msrb.mxu1 %v3505_v9  ;;  %v3634_v9 = vld [vmem:[#allocation15 + $0x21c] sm:$0xf0] }
 0x1d5   : > { %2488 = vmatpush.bf16.msrb.mxu0 %v3397_v13  ;;  %v3621_v13 = vor.u32 %v3842_v11, %v3620_v10  ;;  %v3508_v10 = vld [vmem:[#allocation15 + $0x110] sm:$0xf]  ;;  %v3813_v11 = vld [vmem:[#allocation15 + $0x118] sm:$0xf0] }
 0x1d7   : > { %2472 = vmatpush.bf16.msra.mxu3 %v3621_v13 }
 0x1d9   : > { %2489 = vmatpush.bf16.msrb.mxu0 %v3385_v25 }
 0x1db   : > { %2473 = vmatpush.bf16.msra.mxu3 %v3609_v35 }
 0x1dd   : > { %2490 = vmatpush.bf16.msrb.mxu0 %v3373_v45  ;;  %v3805_v45 = vld [vmem:[#allocation15 + $0xdc] sm:$0xf] }
 0x1df   : > { %2474 = vmatpush.bf16.msra.mxu3 %v3597_v3 }
 0x1e1   : > { %2535 = vmatpush.bf16.msra.mxu0 %v3557_v54 }
 0x21d   : > { %v1715_v1 = vpop.f32.mrf.mxu0 }
 0x21e   : > { %v1716_v4 = vadd.f32 %v1715_v1, %v1316_v53 }
 0x21f   : > { %v1728_v8 = vpop.f32.mrf.mxu1 }
 0x220   : > { %v1729_v15 = vadd.f32 %v1728_v8, %v1716_v4  ;;  %v3544_v4 = vld [vmem:[#allocation15 + $0x158] sm:$0xf] }
 0x221   : > { %v3545_v12 = vor.u32 %v3822_v5, %v3544_v4  ;;  %v3466_v4 = vld [vmem:[#allocation15 + $0xcc] sm:$0xf0]  ;;  %v3844_v5 = vld [vmem:[#allocation15 + $0x214] sm:$0xf] }
 0x223   : > { %v1754_v16 = vpop.f32.mrf.mxu3  ;;  %2536 = vmatpush.bf16.msra.mxu0 %v3545_v12 }
 0x224   : > { %v1741_v19 = vpop.f32.mrf.mxu2  ;;  %v1755_v49 = vadd.f32 %v1754_v16, %v1317_v29  ;;  %v3808_v16 = vld [vmem:[#allocation15 + $0xf4] sm:$0xf] }
 0x225   : > { %v4830_v23 = vadd.f32 %v1741_v19, %v1729_v15  ;;  %v1717_v24 = vpop.f32.mrf.mxu0  ;;  %v3806_v15 = vld [vmem:[#allocation15 + $0xe0] sm:$0xf0]  ;;  %v3493_v25 = vor.u32 %v3808_v16, %v3490_v21 }
 0x226   : > { %v3477_v20 = vor.u32 %v3806_v15, %v3476_v14  ;;  %v1318_v24 = vperm.slane %v4827_v44, 2  ;;  %v3803_v44 = vld [vmem:[#allocation15 + $0xc8] sm:$0xf0]  ;;  %v3637_v14 = vor.u32 %v3844_v5, %v3634_v9  ;;  %v3509_v15 = vor.u32 %v3813_v11, %v3508_v10  ;;  %v3804_v11 = vld [vmem:[#allocation15 + $0xd0] sm:$0xf0] }
 0x227   : > { %v1825_v32 = vsel %vm1027_vm0, %v4830_v23, 0.0  ;;  %v1849_v33 = vmul.f32 %v4830_v23, %v4830_v23  ;;  %v1730_v38 = vpop.f32.mrf.mxu1  ;;  %2501 = vmatpush.bf16.msrb.mxu1 %v3493_v25  ;;  %2537 = vmatpush.bf16.msra.mxu0 %v3533_v30  ;;  %v3841_v25 = vld [vmem:[#allocation15 + $0x1fc] sm:$0xf] }
 0x228   : > { %v1826_v37 = vrot.slane %v1825_v32, 4  ;;  %2463 = vmatpush.bf16.msra.mxu2 %v3477_v20 }
 0x229   : > { %v1852_v43 = vsel %vm1027_vm0, %v1849_v33, 0.0 }
 0x22a   : > { %v1827_v47 = vadd.f32 %v1826_v37, %v1825_v32  ;;  %v1853_v48 = vrot.slane %v1852_v43, 4  ;;  %v3464_v37 = vld [vmem:[#allocation15 + $0xc0] sm:$0xf] }
 0x22b   : > { %v1756_v53 = vpop.f32.mrf.mxu3 }
 0x22c   : > { %v1828_v58 = vrot.slane %v1827_v47, 2  ;;  %v1854_v59 = vadd.f32 %v1853_v48, %v1852_v43  ;;  %v1743_v60 = vpop.f32.mrf.mxu2  ;;  %v3465_v43 = vor.u32 %v3803_v44, %v3464_v37  ;;  %v3572_v37 = vld [vmem:[#allocation15 + $0x198] sm:$0xf]  ;;  %v3830_v44 = vld [vmem:[#allocation15 + $0x1a0] sm:$0xf0] }
 0x22d   : > { %v1767_v1 = vpop.f32.mrf.mxu0  ;;  %v3521_v60 = vor.u32 %v3816_v56, %v3520_v55 }
 0x22e   : > { %v1829_v6 = vadd.f32 %v1828_v58, %v1827_v47  ;;  %v1855_v7 = vrot.slane %v1854_v59, 2  ;;  %v1768_v8 = vadd.f32 %v1767_v1, %v1755_v49  ;;  %v3481_v49 = vor.u32 %v3805_v45, %v3478_v36  ;;  %2464 = vmatpush.bf16.msra.mxu2 %v3465_v43  ;;  %v3838_v45 = vld [vmem:[#allocation15 + $0x1e4] sm:$0xf]  ;;  %v3610_v36 = vld [vmem:[#allocation15 + $0x1ec] sm:$0xf0] }
 0x22f   : > { %v1780_v19 = vpop.f32.mrf.mxu1  ;;  %2538 = vmatpush.bf16.msra.mxu0 %v3521_v60  ;;  %v3573_v43 = vor.u32 %v3830_v44, %v3572_v37  ;;  %v3795_v37 = vld [vmem:[#allocation15 + $0x88] sm:$0xf0] }
 0x230   : > { %v1830_v17 = vrot.slane %v1829_v6, 1  ;;  %v1856_v18 = vadd.f32 %v1855_v7, %v1854_v59  ;;  %v4838_v0 = vadd.f32 %v1780_v19, %v1768_v8  ;;  %v3649_v59 = vor.u32 %v3847_v50, %v3646_v51  ;;  %2502 = vmatpush.bf16.msrb.mxu1 %v3481_v49  ;;  %v3833_v19 = vld [vmem:[#allocation15 + $0x1b8] sm:$0xf0]  ;;  %v3484_v49 = vld [vmem:[#allocation15 + $0xe0] sm:$0xf] }
 0x231   : > { %v3469_v8 = vor.u32 %v3802_v62, %v3466_v4  ;;  %v3807_v50 = vld [vmem:[#allocation15 + $0xe8] sm:$0xf0]  ;;  %v3460_v62 = vld [vmem:[#allocation15 + $0xb0] sm:$0xf] }
 0x232   : > { %v1831_v28 = vadd.f32 %v1830_v17, %v1829_v6  ;;  %v1857_v29 = vrot.slane %v1856_v18, 1  ;;  %v1832_v32 = vsel %vm1027_vm0, %v4838_v0, 0.0  ;;  %v1850_v33 = vmul.f32 %v4838_v0, %v4838_v0  ;;  %2509 = vmatpush.bf16.msrb.mxu2 %v3649_v59  ;;  %v3827_v59 = vld [vmem:[#allocation15 + $0x188] sm:$0xf0] }
 0x233   : > { %v1806_v34 = vpop.f32.mrf.mxu3  ;;  %v1833_v40 = vrot.slane %v1832_v32, 4  ;;  %2539 = vmatpush.bf16.msra.mxu0 %v3509_v15 }
 0x234   : > { %v4846_v38 = vmul.f32 %v1831_v28, %v4786_v41  ;;  %v1858_v39 = vadd.f32 %v1857_v29, %v1856_v18  ;;  %v1793_v42 = vpop.f32.mrf.mxu2  ;;  %v1859_v46 = vsel %vm1027_vm0, %v1850_v33, 0.0  ;;  %v3584_v18 = vld [vmem:[#allocation15 + $0x1b0] sm:$0xf]  ;;  %2503 = vmatpush.bf16.msrb.mxu1 %v3469_v8  ;;  %v3622_v28 = vld [vmem:[#allocation15 + $0x204] sm:$0xf0] }
 0x235   : > { %v1794_v47 = vadd.f32 %v1793_v42, %v1318_v24  ;;  %v1769_v48 = vpop.f32.mrf.mxu0  ;;  %v1834_v54 = vadd.f32 %v1833_v40, %v1832_v32  ;;  %v1860_v58 = vrot.slane %v1859_v46, 4  ;;  %v3585_v24 = vor.u32 %v3833_v19, %v3584_v18  ;;  %v3496_v29 = vld [vmem:[#allocation15 + $0xf8] sm:$0xf]  ;;  %v3810_v32 = vld [vmem:[#allocation15 + $0x100] sm:$0xf0] }
 0x236   : > { %v1873_v52 = vmul.f32 %v1858_v39, %v4786_v41  ;;  %v1876_v53 = vmul.f32 %v4846_v38, %v4846_v38  ;;  %2510 = vmatpush.bf16.msrb.mxu2 %v3637_v14  ;;  %v3497_v35 = vor.u32 %v3810_v32, %v3496_v29  ;;  %v3613_v48 = vor.u32 %v3838_v45, %v3610_v36  ;;  %v3798_v19 = vld [vmem:[#allocation15 + $0xa0] sm:$0xf0] }
 0x237   : > { %v1835_v1 = vrot.slane %v1834_v54, 2  ;;  %v1782_v2 = vpop.f32.mrf.mxu1  ;;  %v1861_v6 = vadd.f32 %v1860_v58, %v1859_v46  ;;  %v1807_v7 = vadd.f32 %v1806_v34, %v1794_v47  ;;  %2475 = vmatpush.bf16.msra.mxu3 %v3585_v24  ;;  %v3625_v34 = vor.u32 %v3841_v25, %v3622_v28  ;;  %v3560_v58 = vld [vmem:[#allocation15 + $0x180] sm:$0xf]  ;;  %v4881_v28 = vld [vmem:[#allocation14] sm:$0x7] }
 0x238   : > { %v1879_v63 = vsub.f32 %v1873_v52, %v1876_v53  ;;  %2540 = vmatpush.bf16.msra.mxu0 %v3497_v35  ;;  %v3485_v53 = vor.u32 %v3807_v50, %v3484_v49  ;;  %v3561_v61 = vor.u32 %v3827_v59, %v3560_v58  ;;  %v1885_v29 = vsub.f32 %v4830_v23, %v4846_v38  ;;  %v3436_v35 = vld [vmem:[#allocation15 + $0x80] sm:$0xf]  ;;  %v3826_v49 = vld [vmem:[#allocation15 + $0x184] sm:$0xf] }
 0x239   : > { %v1836_v13 = vadd.f32 %v1835_v1, %v1834_v54  ;;  %v1862_v16 = vrot.slane %v1861_v6, 2  ;;  %v4870_v54 = vld [vmem:[%s4983_s7] sm:$0x7]  ;;  %v3835_v1 = vld [vmem:[#allocation15 + $0x1cc] sm:$0xf]  ;;  %v1935_v23 = vperm.slane %v4881_v28, 0 }
 0x23a   : > { %v1882_v12 = vmax.f32 %v1879_v63, 0.0  ;;  %2511 = vmatpush.bf16.msrb.mxu2 %v3625_v34  ;;  %v3801_v63 = vld [vmem:[#allocation15 + $0xb8] sm:$0xf0] }
 0x23b   : > { %v1808_v17 = vpop.f32.mrf.mxu3  ;;  %v1837_v21 = vrot.slane %v1836_v13, 1  ;;  %v1863_v26 = vadd.f32 %v1862_v16, %v1861_v6  ;;  %2476 = vmatpush.bf16.msra.mxu3 %v3573_v43  ;;  %v3598_v6 = vld [vmem:[#allocation15 + $0x1d4] sm:$0xf0]  ;;  %v3461_v9 = vor.u32 %v3801_v63, %v3460_v62  ;;  %v3574_v43 = vld [vmem:[#allocation15 + $0x1a4] sm:$0xf0] }
 0x23c   : > { %v4852_v20 = vadd.f32 1e-05, %v1882_v12  ;;  %v1795_v22 = vpop.f32.mrf.mxu2  ;;  %2541 = vmatpush.bf16.msra.mxu0 %v3485_v53  ;;  %v3601_v10 = vor.u32 %v3835_v1, %v3598_v6  ;;  %v3448_v16 = vld [vmem:[#allocation15 + $0x98] sm:$0xf]  ;;  %v1889_v17 = vperm.slane %v4870_v54, 0 }
 0x23d   : > { %v1819_v27 = vpop.f32.mrf.mxu0  ;;  %v1838_v30 = vadd.f32 %v1837_v21, %v1836_v13  ;;  %v1864_v33 = vrot.slane %v1863_v26, 1  ;;  %v3832_v21 = vld [vmem:[#allocation15 + $0x1b4] sm:$0xf]  ;;  %v3412_v63 = vld [vmem:[#allocation15 + $0x50] sm:$0xf] }
 0x23e   : > { %3997 = vrsqrt.f32 %v4852_v20  ;;  %v4855_v31 = vadd.f32 %v1819_v27, %v1807_v7  ;;  %2512 = vmatpush.bf16.msrb.mxu2 %v3613_v48  ;;  %v3472_v7 = vld [vmem:[#allocation15 + $0xc8] sm:$0xf]  ;;  %v3586_v27 = vld [vmem:[#allocation15 + $0x1bc] sm:$0xf0]  ;;  %vm1907_vm2 = vweird.f32 %v4852_v20  ;;  %v3792_v48 = vld [vmem:[#allocation15 + $0x70] sm:$0xf0] }
 0x23f   : > { %v4858_v39 = vmul.f32 %v1838_v30, %v4786_v41  ;;  %v1865_v46 = vadd.f32 %v1864_v33, %v1863_v26  ;;  %2477 = vmatpush.bf16.msra.mxu3 %v3561_v61  ;;  %v3473_v15 = vor.u32 %v3804_v11, %v3472_v7  ;;  %v3449_v26 = vor.u32 %v3798_v19, %v3448_v16  ;;  %v3789_v1 = vld [vmem:[#allocation15 + $0x58] sm:$0xf0]  ;;  %v3846_v16 = vld [vmem:[#allocation15 + $0x220] sm:$0xf0] }
 0x240   : > { %v1839_v40 = vsel %vm1027_vm0, %v4855_v31, 0.0  ;;  %v1851_v42 = vmul.f32 %v4855_v31, %v4855_v31  ;;  %v3589_v32 = vor.u32 %v3832_v21, %v3586_v27  ;;  %v1890_v7 = vperm.slane %v4870_v54, 1  ;;  %v3388_v21 = vld [vmem:[#allocation15 + $0x20] sm:$0xf] }
 0x241   : > { %v1840_v47 = vrot.slane %v1839_v40, 4  ;;  %v1877_v51 = vmul.f32 %v4858_v39, %v4858_v39  ;;  %v1874_v55 = vmul.f32 %v1865_v46, %v4786_v41  ;;  %2542 = vmatpush.bf16.msra.mxu0 %v3473_v15  ;;  %v1895_v46 = vmul.f32 %v1889_v17, %v1885_v29  ;;  %v3640_v15 = vld [vmem:[#allocation15 + $0x218] sm:$0xf]  ;;  %v3786_v17 = vld [vmem:[#allocation15 + $0x40] sm:$0xf0] }
 0x242   : > { %v1866_v52 = vsel %vm1027_vm0, %v1851_v42, 0.0  ;;  %2513 = vmatpush.bf16.msrb.mxu2 %v3601_v10  ;;  %v3829_v42 = vld [vmem:[#allocation15 + $0x19c] sm:$0xf]  ;;  %v3628_v27 = vld [vmem:[#allocation15 + $0x200] sm:$0xf] }
 0x243   : > { %v1841_v56 = vadd.f32 %v1840_v47, %v1839_v40  ;;  %v1867_v57 = vrot.slane %v1866_v52, 4  ;;  %v1880_v3 = vsub.f32 %v1874_v55, %v1877_v51  ;;  %2522 = vmatpush.bf16.msrb.mxu3 %v3461_v9  ;;  %v3437_v40 = vor.u32 %v3795_v37, %v3436_v35  ;;  %v3843_v29 = vld [vmem:[#allocation15 + $0x208] sm:$0xf0]  ;;  %v3780_v35 = vld [vmem:[#allocation15 + $0x10] sm:$0xf0] }
 0x244   : > { %v4873_v60 = vpop.eup %3997  ;;  %v3577_v36 = vor.u32 %v3829_v42, %v3574_v43  ;;  %v3616_v42 = vld [vmem:[#allocation15 + $0x1e8] sm:$0xf]  ;;  %v3840_v43 = vld [vmem:[#allocation15 + $0x1f0] sm:$0xf0] }
 0x245   : > { %v1902_v2 = vmul.f32 %v4873_v60, %v4852_v20  ;;  %v1842_v4 = vrot.slane %v1841_v56, 2  ;;  %v1821_v5 = vpop.f32.mrf.mxu0  ;;  %v1868_v8 = vadd.f32 %v1867_v57, %v1866_v52  ;;  %v1883_v13 = vmax.f32 %v1880_v3, 0.0  ;;  %v3424_v20 = vld [vmem:[#allocation15 + $0x68] sm:$0xf]  ;;  %v3562_v52 = vld [vmem:[#allocation15 + $0x18c] sm:$0xf0] }
 0x246   : > { %vm1908_vm15 = vweird.f32 %v4873_v60  ;;  %2514 = vmatpush.bf16.msrb.mxu2 %v3589_v32  ;;  %v3565_v58 = vor.u32 %v3826_v49, %v3562_v52  ;;  %v3413_v3 = vor.u32 %v3789_v1, %v3412_v63  ;;  %v3837_v49 = vld [vmem:[#allocation15 + $0x1d8] sm:$0xf0]  ;;  %v3831_v63 = vld [vmem:[#allocation15 + $0x1a8] sm:$0xf0] }
 0x247   : > { %v1903_v12 = vmul.f32 %v4873_v60, %v1902_v2  ;;  %v1843_v14 = vadd.f32 %v1842_v4, %v1841_v56  ;;  %v1869_v18 = vrot.slane %v1868_v8, 2  ;;  %v4879_v24 = vadd.f32 1e-05, %v1883_v13  ;;  %2523 = vmatpush.bf16.msrb.mxu3 %v3449_v26  ;;  %vm1909_vm3 = vmor %vm1907_vm2, %vm1908_vm15  ;;  %v3652_v2 = vld [vmem:[#allocation15 + $0x230] sm:$0xf] }
 0x248   : > { %v3425_v56 = vor.u32 %v3792_v48, %v3424_v20  ;;  %v1886_v13 = vsub.f32 %v4838_v0, %v4858_v39  ;;  %v3641_v0 = vor.u32 %v3846_v16, %v3640_v15  ;;  %v1936_v26 = vperm.slane %v4881_v28, 1  ;;  %v3604_v48 = vld [vmem:[#allocation15 + $0x1d0] sm:$0xf]  ;;  %v2052_v15 = vld [vmem:[%s5016_s30] sm:$0x7] }
 0x249   : > { %v1904_v22 = vmul.f32 0.5, %v1903_v12  ;;  %v1844_v25 = vrot.slane %v1843_v14, 1  ;;  %v1870_v30 = vadd.f32 %v1869_v18, %v1868_v8  ;;  %3999 = vrsqrt.f32 %v4879_v24  ;;  %v3400_v12 = vld [vmem:[#allocation15 + $0x38] sm:$0xf] }
 0x24a   : > { %2515 = vmatpush.bf16.msrb.mxu2 %v3577_v36  ;;  %v3401_v19 = vor.u32 %v3786_v17, %v3400_v12  ;;  %vm1917_vm6 = vweird.f32 %v4879_v24  ;;  %v1896_v39 = vmul.f32 %v1890_v7, %v1886_v13 }
 0x24b   : > { %v1905_v33 = vsub.f32 1.5, %v1904_v22  ;;  %v1845_v34 = vadd.f32 %v1844_v25, %v1843_v14  ;;  %v1871_v44 = vrot.slane %v1870_v30, 1  ;;  %2524 = vmatpush.bf16.msrb.mxu3 %v3437_v40  ;;  %v3783_v22 = vld [vmem:[#allocation15 + $0x28] sm:$0xf0] }
 0x24c   : > { %v3389_v32 = vor.u32 %v3783_v22, %v3388_v21  ;;  %v2055_v21 = vperm.slane %v2052_v15, 1 }
 0x24d   : > { %v1906_v45 = vmul.f32 %v4873_v60, %v1905_v33  ;;  %v4893_v38 = vmul.f32 %v1845_v34, %v4786_v41  ;;  %v1872_v47 = vadd.f32 %v1871_v44, %v1870_v30  ;;  %v3376_v34 = vld [vmem:[#allocation15 + $0x8] sm:$0xf]  ;;  %v3629_v44 = vor.u32 %v3843_v29, %v3628_v27 }
 0x24e   : > { %2516 = vmatpush.bf16.msrb.mxu2 %v3565_v58  ;;  %v3834_v58 = vld [vmem:[#allocation15 + $0x1c0] sm:$0xf0] }
 0x24f   : > { %v1910_v50 = vsel %vm1909_vm3, %v4873_v60, %v1906_v45  ;;  %v1878_v51 = vmul.f32 %v4893_v38, %v4893_v38  ;;  %v1875_v55 = vmul.f32 %v1872_v47, %v4786_v41  ;;  %v4000_v57 = vpop.eup %3999  ;;  %v3849_v60 = vld [vmem:[#allocation15 + $0x238] sm:$0xf0]  ;;  %2525 = vmatpush.bf16.msrb.mxu3 %v3425_v56  ;;  %v3377_v45 = vor.u32 %v3780_v35, %v3376_v34 }
 0x250   : > { %v1931_v53 = vmul.f32 %v1910_v50, %v1895_v46  ;;  %v1912_v61 = vmul.f32 %v4000_v57, %v4879_v24  ;;  %v3653_v11 = vor.u32 %v3849_v60, %v3652_v2  ;;  %vm1918_vm5 = vweird.f32 %v4000_v57 }
 0x251   : > { %v1881_v62 = vsub.f32 %v1875_v55, %v1878_v51  ;;  %vm1919_vm7 = vmor %vm1917_vm6, %vm1918_vm5  ;;  %v3617_v46 = vor.u32 %v3840_v43, %v3616_v42  ;;  %v1887_v50 = vsub.f32 %v4855_v31, %v4893_v38  ;;  %v1891_v51 = vperm.slane %v4870_v54, 2  ;;  %v3580_v38 = vld [vmem:[#allocation15 + $0x1a0] sm:$0xf] }
 0x252   : > { %v1941_v59 = vadd.f32 %v1935_v23, %v1931_v53  ;;  %v1913_v4 = vmul.f32 %v4000_v57, %v1912_v61  ;;  %v3605_v55 = vor.u32 %v3837_v49, %v3604_v48  ;;  %v1937_v61 = vperm.slane %v4881_v28, 2 }
 0x253   : > { %v1884_v5 = vmax.f32 %v1881_v62, 0.0  ;;  %2526 = vmatpush.bf16.msrb.mxu3 %v3413_v3  ;;  %v3581_v2 = vor.u32 %v3831_v63, %v3580_v38  ;;  %v3568_v3 = vld [vmem:[#allocation15 + $0x188] sm:$0xf] }
 0x254   : > { %vm1944_vm4 = vcmp.ge.f32.partialorder %v1941_v59, 0.0  ;;  %v1947_v6 = vmul.f32 0.1, %v1941_v59  ;;  %v1914_v8 = vmul.f32 0.5, %v1913_v4  ;;  %v3828_v4 = vld [vmem:[#allocation15 + $0x190] sm:$0xf0] }
 0x255   : > { %v4901_v9 = vadd.f32 1e-05, %v1884_v5  ;;  %v3569_v7 = vor.u32 %v3828_v4, %v3568_v3 }
 0x256   : > { %v1950_v10 = vsel %vm1944_vm4, %v1941_v59, %v1947_v6  ;;  %v1915_v18 = vsub.f32 1.5, %v1914_v8  ;;  %v1897_v59 = vmul.f32 %v1891_v51, %v1887_v50 }
 0x257   : > { %v4905_v14 = vpack.c.bf16 %v1950_v10, %v1950_v10  ;;  %4001 = vrsqrt.f32 %v4901_v9  ;;  %2527 = vmatpush.bf16.msrb.mxu3 %v3401_v19  ;;  %vm1927_vm10 = vweird.f32 %v4901_v9 }
 0x258   : > { %v1916_v25 = vmul.f32 %v4000_v57, %v1915_v18  ;;  %v2054_v18 = vperm.slane %v2052_v15, 0 }
 0x259   : > { %2452 = vmatmul.bf16.vlgmr.msra.gmra.mxu1 %v4905_v14  ;;  %2491 = vmatmul.bf16.vlgmr.msrb.gmra.mxu0 %v4905_v14 }
 0x25a   : > { %2548 = vmatpush.bf16.msra.mxu1 %v3653_v11  ;;  %v1920_v30 = vsel %vm1919_vm7, %v4000_v57, %v1916_v25  ;;  %v3592_v57 = vld [vmem:[#allocation15 + $0x1b8] sm:$0xf] }
 0x25b   : > { %v1932_v33 = vmul.f32 %v1920_v30, %v1896_v39  ;;  %2528 = vmatpush.bf16.msrb.mxu3 %v3389_v32  ;;  %v3593_v54 = vor.u32 %v3834_v58, %v3592_v57  ;;  %v2056_v58 = vperm.slane %v2052_v15, 2 }
 0x25d   : > { %v4002_v37 = vpop.eup %4001  ;;  %v1942_v40 = vadd.f32 %v1936_v26, %v1932_v33 }
 0x25e   : > { %2549 = vmatpush.bf16.msra.mxu1 %v3641_v0  ;;  %v1922_v24 = vmul.f32 %v4002_v37, %v4901_v9  ;;  %vm1928_vm9 = vweird.f32 %v4002_v37 }
 0x25f   : > { %vm1945_vm8 = vcmp.ge.f32.partialorder %v1942_v40, 0.0  ;;  %v1948_v36 = vmul.f32 0.1, %v1942_v40  ;;  %2529 = vmatpush.bf16.msrb.mxu3 %v3377_v45  ;;  %vm1929_vm11 = vmor %vm1927_vm10, %vm1928_vm9 }
 0x260   : > { %v1923_v23 = vmul.f32 %v4002_v37, %v1922_v24 }
 0x261   : > { %v1951_v20 = vsel %vm1945_vm8, %v1942_v40, %v1948_v36 }
 0x262   : > { %2550 = vmatpush.bf16.msra.mxu1 %v3629_v44  ;;  %v1924_v47 = vmul.f32 0.5, %v1923_v23  ;;  %v1954_v52 = vpack.c.bf16 %v1951_v20, %v1951_v20 }
 0x264   : > { %v1925_v53 = vsub.f32 1.5, %v1924_v47  ;;  %2465 = vmatmul.bf16.vlgmr.msra.gmra.mxu2 %v1954_v52 }
 0x266   : > { %2551 = vmatpush.bf16.msra.mxu1 %v3617_v46  ;;  %v1926_v56 = vmul.f32 %v4002_v37, %v1925_v53 }
 0x268   : > { %v1930_v62 = vsel %vm1929_vm11, %v4002_v37, %v1926_v56 }
 0x269   : > { %2504 = vmatmul.bf16.vlgmr.msrb.gmra.mxu1 %v1954_v52  ;;  %2543 = vmatmul.bf16.vlgmr.msra.gmra.mxu0 %v1954_v52  ;;  %v1933_v31 = vmul.f32 %v1930_v62, %v1897_v59 }
 0x26a   : > { %2552 = vmatpush.bf16.msra.mxu1 %v3605_v55 }
 0x26b   : > { %v1943_v1 = vadd.f32 %v1937_v61, %v1933_v31 }
 0x26d   : > { %vm1946_vm12 = vcmp.ge.f32.partialorder %v1943_v1, 0.0  ;;  %v1949_v60 = vmul.f32 0.1, %v1943_v1 }
 0x26e   : > { %2553 = vmatpush.bf16.msra.mxu1 %v3593_v54 }
 0x26f   : > { %v1952_v5 = vsel %vm1946_vm12, %v1943_v1, %v1949_v60 }
 0x270   : > { %v1955_v6 = vpack.c.bf16 %v1952_v5, %v1952_v5 }
 0x272   : > { %2554 = vmatpush.bf16.msra.mxu1 %v3581_v2  ;;  %2478 = vmatmul.bf16.vlgmr.msra.gmra.mxu3 %v1955_v6 }
 0x274   : > { %2517 = vmatmul.bf16.vlgmr.msrb.gmra.mxu2 %v1955_v6 }
 0x276   : > { %2555 = vmatpush.bf16.msra.mxu1 %v3569_v7 }
 0x279   : > { %2556 = vmatmul.bf16.vlgmr.msra.gmra.mxu1 %v1955_v6 }
 0x282   : > { %2530 = vmatmul.bf16.vlgmr.msrb.gmra.mxu3 %v4905_v14 }
 0x2d6   : > { %v2453_v28 = vpop.f32.mrf.mxu1  ;;  %v2492_v8 = vpop.f32.mrf.mxu0 }
 0x2d7   : > { %v2454_v22 = vadd.f32 %v2453_v28, %v2054_v18  ;;  %v2493_v0 = vadd.f32 %v2492_v8, %v2055_v21 }
 0x2de   : > { %v2455_v9 = vpop.f32.mrf.mxu1  ;;  %v2494_v10 = vpop.f32.mrf.mxu0 }
 0x2e6   : > { %v2505_v11 = vpop.f32.mrf.mxu1  ;;  %v2544_v12 = vpop.f32.mrf.mxu0 }
 0x2e7   : > { %v2466_v13 = vpop.f32.mrf.mxu2  ;;  %v2506_v27 = vadd.f32 %v2505_v11, %v2493_v0 }
 0x2e8   : > { %v2467_v25 = vadd.f32 %v2466_v13, %v2454_v22 }
 0x2ee   : > { %v2507_v16 = vpop.f32.mrf.mxu1  ;;  %v2546_v17 = vpop.f32.mrf.mxu0 }
 0x2ef   : > { %v2468_v19 = vpop.f32.mrf.mxu2 }
 0x2f5   : > { %v2479_v14 = vpop.f32.mrf.mxu3 }
 0x2f6   : > { %v2557_v39 = vpop.f32.mrf.mxu1  ;;  %v4922_v26 = vadd.f32 %v2479_v14, %v2467_v25 }
 0x2f7   : > { %v2518_v32 = vpop.f32.mrf.mxu2 }
 0x2f8   : > { %v2563_v29 = vsel %vm1027_vm0, %v4922_v26, 0.0  ;;  %v2587_v30 = vmul.f32 %v4922_v26, %v4922_v26  ;;  %v4928_v34 = vadd.f32 %v2518_v32, %v2506_v27 }
 0x2f9   : > { %v2564_v33 = vrot.slane %v2563_v29, 4 }
 0x2fa   : > { %v2590_v35 = vsel %vm1027_vm0, %v2587_v30, 0.0  ;;  %v2570_v40 = vsel %vm1027_vm0, %v4928_v34, 0.0  ;;  %v2588_v24 = vmul.f32 %v4928_v34, %v4928_v34 }
 0x2fb   : > { %v2565_v37 = vadd.f32 %v2564_v33, %v2563_v29  ;;  %v2591_v44 = vrot.slane %v2590_v35, 4  ;;  %v2571_v42 = vrot.slane %v2570_v40, 4 }
 0x2fc   : > { %v2597_v23 = vsel %vm1027_vm0, %v2588_v24, 0.0 }
 0x2fd   : > { %v2566_v43 = vrot.slane %v2565_v37, 2  ;;  %v2592_v45 = vadd.f32 %v2591_v44, %v2590_v35  ;;  %v2481_v36 = vpop.f32.mrf.mxu3  ;;  %v2572_v47 = vadd.f32 %v2571_v42, %v2570_v40  ;;  %v2598_v20 = vrot.slane %v2597_v23, 4 }
 0x2fe   : > { %v2559_v46 = vpop.f32.mrf.mxu1 }
 0x2ff   : > { %v2567_v48 = vadd.f32 %v2566_v43, %v2565_v37  ;;  %v2593_v49 = vrot.slane %v2592_v45, 2  ;;  %v2573_v50 = vrot.slane %v2572_v47, 2  ;;  %v2599_v51 = vadd.f32 %v2598_v20, %v2597_v23  ;;  %v2520_v52 = vpop.f32.mrf.mxu2 }
 0x300   : > { %v2561_v52 = vld [vmem:[#allocation17] sm:$0x7] }
 0x301   : > { %v2568_v53 = vrot.slane %v2567_v48, 1  ;;  %v2594_v55 = vadd.f32 %v2593_v49, %v2592_v45  ;;  %v2574_v56 = vadd.f32 %v2573_v50, %v2572_v47  ;;  %v2600_v57 = vrot.slane %v2599_v51, 2 }
 0x303   : > { %v2569_v59 = vadd.f32 %v2568_v53, %v2567_v48  ;;  %v2595_v61 = vrot.slane %v2594_v55, 1  ;;  %v2575_v62 = vrot.slane %v2574_v56, 1  ;;  %v2601_v31 = vadd.f32 %v2600_v57, %v2599_v51 }
 0x305   : > { %v4937_v54 = vmul.f32 %v2569_v59, %v4786_v41  ;;  %v2596_v38 = vadd.f32 %v2595_v61, %v2594_v55  ;;  %v2531_v63 = vpop.f32.mrf.mxu3  ;;  %v2576_v1 = vadd.f32 %v2575_v62, %v2574_v56  ;;  %v2602_v2 = vrot.slane %v2601_v31, 1  ;;  %v2562_v61 = vld [vmem:[#allocation18] sm:$0x7] }
 0x306   : > { %v2532_v60 = vadd.f32 %v2531_v63, %v2056_v58  ;;  %v2628_v56 = vperm.slane %v2561_v52, 1  ;;  %v2627_v62 = vperm.slane %v2561_v52, 0 }
 0x307   : > { %v2611_v3 = vmul.f32 %v2596_v38, %v4786_v41  ;;  %v2614_v4 = vmul.f32 %v4937_v54, %v4937_v54  ;;  %v2585_v5 = vmul.f32 %v2576_v1, %v4786_v41  ;;  %v2603_v6 = vadd.f32 %v2602_v2, %v2601_v31 }
 0x308   : > { %v2545_v7 = vadd.f32 %v2544_v12, %v2532_v60  ;;  %v2623_v38 = vsub.f32 %v4922_v26, %v4937_v54  ;;  %v2674_v1 = vperm.slane %v2562_v61, 1  ;;  %v2675_v54 = vperm.slane %v2562_v61, 2 }
 0x309   : > { %v2617_v28 = vsub.f32 %v2611_v3, %v2614_v4  ;;  %v2612_v8 = vmul.f32 %v2603_v6, %v4786_v41  ;;  %v2615_v9 = vmul.f32 %v2585_v5, %v2585_v5  ;;  %v2624_v55 = vsub.f32 %v4928_v34, %v2585_v5 }
 0x30a   : > { %v4944_v10 = vadd.f32 %v2557_v39, %v2545_v7  ;;  %v2633_v3 = vmul.f32 %v2627_v62, %v2623_v38  ;;  %v2629_v7 = vperm.slane %v2561_v52, 2 }
 0x30b   : > { %v2620_v11 = vmax.f32 %v2617_v28, 0.0  ;;  %v2618_v13 = vsub.f32 %v2612_v8, %v2615_v9  ;;  %v2673_v8 = vperm.slane %v2562_v61, 0 }
 0x30c   : > { %v2577_v15 = vsel %vm1027_vm0, %v4944_v10, 0.0  ;;  %v2589_v16 = vmul.f32 %v4944_v10, %v4944_v10 }
 0x30d   : > { %v2636_v17 = vadd.f32 1e-05, %v2620_v11  ;;  %v2578_v18 = vrot.slane %v2577_v15, 4  ;;  %v2533_v19 = vpop.f32.mrf.mxu3  ;;  %v2621_v21 = vmax.f32 %v2618_v13, 0.0 }
 0x30e   : > { %v2604_v12 = vsel %vm1027_vm0, %v2589_v16, 0.0 }
 0x30f   : > { %v2579_v22 = vadd.f32 %v2578_v18, %v2577_v15  ;;  %v2605_v25 = vrot.slane %v2604_v12, 4  ;;  %4003 = vrsqrt.f32 %v2636_v17  ;;  %v2637_v0 = vadd.f32 1e-05, %v2621_v21 }
 0x310   : > { %vm2645_vm3 = vweird.f32 %v2636_v17 }
 0x311   : > { %v2580_v14 = vrot.slane %v2579_v22, 2  ;;  %v2606_v39 = vadd.f32 %v2605_v25, %v2604_v12  ;;  %4005 = vrsqrt.f32 %v2637_v0  ;;  %vm2655_vm14 = vweird.f32 %v2637_v0 }
 0x313   : > { %v2581_v27 = vadd.f32 %v2580_v14, %v2579_v22  ;;  %v2607_v29 = vrot.slane %v2606_v39, 2 }
 0x315   : > { %v2582_v30 = vrot.slane %v2581_v27, 1  ;;  %v2608_v32 = vadd.f32 %v2607_v29, %v2606_v39  ;;  %v4004_v33 = vpop.eup %4003 }
 0x316   : > { %v2640_v40 = vmul.f32 %v4004_v33, %v2636_v17  ;;  %vm2646_vm2 = vweird.f32 %v4004_v33 }
 0x317   : > { %v2583_v35 = vadd.f32 %v2582_v30, %v2581_v27  ;;  %v2609_v37 = vrot.slane %v2608_v32, 1  ;;  %v4006_v44 = vpop.eup %4005  ;;  %vm2647_vm4 = vmor %vm2645_vm3, %vm2646_vm2 }
 0x318   : > { %v2650_v24 = vmul.f32 %v4006_v44, %v2637_v0  ;;  %v2641_v46 = vmul.f32 %v4004_v33, %v2640_v40  ;;  %vm2656_vm13 = vweird.f32 %v4006_v44 }
 0x319   : > { %v2586_v42 = vmul.f32 %v2583_v35, %v4786_v41  ;;  %v2610_v43 = vadd.f32 %v2609_v37, %v2608_v32  ;;  %vm2657_vm15 = vmor %vm2655_vm14, %vm2656_vm13 }
 0x31a   : > { %v2651_v45 = vmul.f32 %v4006_v44, %v2650_v24  ;;  %v2642_v50 = vmul.f32 0.5, %v2641_v46 }
 0x31b   : > { %v2613_v23 = vmul.f32 %v2610_v43, %v4786_v41  ;;  %v2616_v36 = vmul.f32 %v2586_v42, %v2586_v42  ;;  %v2634_v41 = vmul.f32 %v2628_v56, %v2624_v55  ;;  %v2625_v6 = vsub.f32 %v4944_v10, %v2586_v42 }
 0x31c   : > { %v2652_v47 = vmul.f32 0.5, %v2651_v45  ;;  %v2643_v57 = vsub.f32 1.5, %v2642_v50 }
 0x31d   : > { %v2619_v20 = vsub.f32 %v2613_v23, %v2616_v36  ;;  %v2635_v26 = vmul.f32 %v2629_v7, %v2625_v6 }
 0x31e   : > { %v2653_v48 = vsub.f32 1.5, %v2652_v47  ;;  %v2644_v31 = vmul.f32 %v4004_v33, %v2643_v57 }
 0x31f   : > { %v2622_v49 = vmax.f32 %v2619_v20, 0.0 }
 0x320   : > { %v2654_v53 = vmul.f32 %v4006_v44, %v2653_v48  ;;  %v2648_v60 = vsel %vm2647_vm4, %v4004_v33, %v2644_v31 }
 0x321   : > { %v2638_v51 = vadd.f32 1e-05, %v2622_v49  ;;  %v2669_v28 = vmul.f32 %v2648_v60, %v2633_v3 }
 0x322   : > { %v2658_v58 = vsel %vm2657_vm15, %v4006_v44, %v2654_v53 }
 0x323   : > { %4007 = vrsqrt.f32 %v2638_v51  ;;  %v2670_v63 = vmul.f32 %v2658_v58, %v2634_v41  ;;  %vm2665_vm6 = vweird.f32 %v2638_v51  ;;  %v2679_v15 = vadd.f32 %v2673_v8, %v2669_v28 }
 0x325   : > { %v2680_v4 = vadd.f32 %v2674_v1, %v2670_v63  ;;  %v2685_v21 = vmul.f32 0.1, %v2679_v15  ;;  %vm2682_vm9 = vcmp.ge.f32.partialorder %v2679_v15, 0.0 }
 0x327   : > { %v2686_v11 = vmul.f32 0.1, %v2680_v4  ;;  %vm2683_vm7 = vcmp.ge.f32.partialorder %v2680_v4, 0.0  ;;  %v2688_v25 = vsel %vm2682_vm9, %v2679_v15, %v2685_v21 }
 0x329   : > { %v4008_v59 = vpop.eup %4007  ;;  %v2689_v18 = vsel %vm2683_vm7, %v2680_v4, %v2686_v11 }
 0x32a   : > { %v2660_v2 = vmul.f32 %v4008_v59, %v2638_v51  ;;  %vm2666_vm5 = vweird.f32 %v4008_v59  ;;  %v2694_v10 = vrot.slane %v2689_v18, 6 }
 0x32b   : > { %vm2667_vm8 = vmor %vm2665_vm6, %vm2666_vm5 }
 0x32c   : > { %v2661_v34 = vmul.f32 %v4008_v59, %v2660_v2  ;;  %v2696_v14 = vsel %vm1027_vm0, %v2688_v25, %v2694_v10 }
 0x32e   : > { %v2662_v5 = vmul.f32 0.5, %v2661_v34 }
 0x330   : > { %v2663_v9 = vsub.f32 1.5, %v2662_v5 }
 0x332   : > { %v2664_v13 = vmul.f32 %v4008_v59, %v2663_v9 }
 0x334   : > { %v2668_v16 = vsel %vm2667_vm8, %v4008_v59, %v2664_v13 }
 0x335   : > { %v2671_v17 = vmul.f32 %v2668_v16, %v2635_v26 }
 0x337   : > { %v2681_v19 = vadd.f32 %v2675_v54, %v2671_v17 }
 0x339   : > { %vm2684_vm10 = vcmp.ge.f32.partialorder %v2681_v19, 0.0  ;;  %v2687_v12 = vmul.f32 0.1, %v2681_v19 }
 0x33b   : > { %v2690_v22 = vsel %vm2684_vm10, %v2681_v19, %v2687_v12 }
 0x33c   : > { %v2695_v0 = vrot.slane %v2690_v22, 4 }
 0x33e   : > { %v2697_v39 = vsel %vm1029_vm1, %v2696_v14, %v2695_v0 }
 0x33f   : > { %2699 = vst [vmem:[#allocation20] sm:$0x3f] %v2697_v39 }
 0x340 PF: > { %p3942_p3 = scmp.eq.s32.totalorder %s4508_s15, 2  ;;  %s4413_s18 = smov [#allocation20]  }
 0x341   : > { %s2706_s2 = sshll.u32 %s4413_s18, 4  ;;  %s5017_s8 = sld [smem:[#allocation37_spill]]  ;;  %s2707_s2 = int_to_ptr.vmem [resolvable:$true] %s2706_s2 }
 0x347   : > { %s2708_s9 = sshll.u32 %s5017_s8, 4  ;;  %s2709_s9 = int_to_ptr.hbm [resolvable:$true] %s2708_s9 }
 0x348   : > { %3890 = dma.vmem_to_hbm [thread:$0]  (%p3942_p3), %s2707_s2, 96, %s2709_s9, [#allocation5]  }
 0x349   : > { %4382 = dma.done.wait (%p3942_p3), [#allocation5], 96  }
 0x34a   : > { %4384 = vsyncadd (%p3942_p3), [#allocation5], 4294967200 }
 0x34b PF: > { %p31_p4 = scmp.ge.s32.totalorder %s4570_s17, 5   ;;  %s5018_s25 = smov %s4391_s26 }
 0x34c   : > { %s5019_s26 = smov %s4395_s27  ;;  %s5020_s27 = smov %s4582_s20 }
 0x34d   : > { %s5021_s28 = smov %s4570_s17  ;;  %33 = sbr.rel (!%p31_p4) target bundleno = 20 (0x14), region = 162 }
 0x352   :  { %2722 = vsyncpa [#allocation4], 1 }
 0x353   :  { %2724 = vsyncpa [#allocation4 + $0x1], 1 }
 0x354   :  { %2725 = vsyncpa [#allocation7], 1 }
 0x355   :  { %2727 = vsyncpa [#allocation7 + $0x1], 1 }
 0x356   :  { %2728 = vsyncpa [#allocation10], 1 }
 0x357   :  { %2729 = vsyncpa [#allocation13], 1 }
 0x358   :  { %2730 = vsyncpa [#allocation16], 1 }
 0x359   :  { %2731 = vsyncpa [#allocation19], 1 }
 0x35a   :  { %2732 = vsyncpa [#allocation5], 1 }
 0x35b   :  { %2734 = vsyncpa [#allocation5 + $0x1], 1 }

</bundles_post_ra>
